<compile_context>
chip_gen: v6e
topology: v6e:2x2x1
jax: 0.10.0
libtpu: 0.0.40
codegen_flags: <defaults>
</compile_context>

<pallas_src>
import jax
import jax.numpy as jnp
from jax.experimental import pallas as pl
from jax.experimental.pallas import tpu as pltpu


# -----------------------------------------------------------------------------
# Fused kernel: all LSTM layers + Linear head + sigmoid in one pallas_call.
# -----------------------------------------------------------------------------
def _make_fused_kernel(num_layers, T, H):
    n_in = 1 + 3 * num_layers + 4  # x, (wih, whh, b)*L, h0, c0, head_w, head_b

    def _rows_to_slab(rows, width):
        """Assemble a list of (1, width) row values into a (len(rows), width)
        value with a pure-VPU select build (no masked stores, no scratch)."""
        n = len(rows)
        row_id = jax.lax.broadcasted_iota(jnp.int32, (n, width), 0)
        slab = jnp.zeros((n, width), jnp.float32)
        for r, row in enumerate(rows):
            slab = jnp.where(row_id == r, row, slab)
        return slab

    def kernel(*refs):
        in_refs = refs[:n_in]
        out_ref, hn_ref, cn_ref = refs[n_in:]

        x_ref = in_refs[0]
        h0_ref = in_refs[1 + 3 * num_layers]
        c0_ref = in_refs[2 + 3 * num_layers]
        hw_ref = in_refs[3 + 3 * num_layers]         # (H, O) bf16
        hb_ref = in_refs[4 + 3 * num_layers]         # (1, O) f32

        # --- Aliasing safety: read h0/c0 fully BEFORE any output write. ---
        h0_all = h0_ref[...]                         # (L, H) f32
        c0_all = c0_ref[...]                         # (L, H) f32
        h = [h0_all[l:l + 1, :] for l in range(num_layers)]
        c = [c0_all[l:l + 1, :] for l in range(num_layers)]

        # Load weights once as values.  No weight casts inside the kernel:
        # layer-0 wih / head W arrive pre-cast bf16, everything on the serial
        # chain is f32.
        wih0 = in_refs[1][...]                                     # (in,4H) bf16
        whh = [in_refs[2 + 3 * l][...] for l in range(num_layers)]  # (H,4H) f32
        b = [in_refs[3 + 3 * l][...] for l in range(num_layers)]    # (1,4H) f32
        wih_deep = [in_refs[1 + 3 * l][...]                         # (H,4H) f32
                    for l in range(1, num_layers)]

        # Layer-0 input projection for every timestep: one MXU slab matmul
        # (bf16 in, f32 accumulate), bias folded in.  Off the serial chain.
        xw0 = jnp.dot(x_ref[...].astype(jnp.bfloat16), wih0,
                      preferred_element_type=jnp.float32) + b[0]    # (T, 4H)

        def lstm_cell(gates, c_prev):
            sg = jax.nn.sigmoid(gates)               # full-width EUP pass (i,f,o)
            g_g = jnp.tanh(gates[:, 2 * H:3 * H])    # tanh only on the g slice
            i_g = sg[:, 0 * H:1 * H]
            f_g = sg[:, 1 * H:2 * H]
            o_g = sg[:, 3 * H:4 * H]
            c_new = f_g * c_prev + i_g * g_g
            h_new = o_g * jnp.tanh(c_new)
            return h_new, c_new

        # Wavefront: time-major, fully unrolled (T, L static & tiny).  Deeper
        # layers consume h[l-1] of the SAME timestep as a value, so the
        # dependence graph is the (T + L - 1)-deep wavefront.
        y_rows = []
        for t in range(T):
            # Layer 0: precomputed input projection + f32 recurrent matmul.
            gates0 = xw0[t:t + 1, :] + jnp.dot(
                h[0], whh[0], preferred_element_type=jnp.float32)
            h[0], c[0] = lstm_cell(gates0, c[0])
            # Deeper layers: per-step input projection (all f32, no casts).
            for l in range(1, num_layers):
                gates = (jnp.dot(h[l - 1], wih_deep[l - 1],
                                 preferred_element_type=jnp.float32)
                         + jnp.dot(h[l], whh[l],
                                   preferred_element_type=jnp.float32)
                         + b[l])
                h[l], c[l] = lstm_cell(gates, c[l])
            y_rows.append(h[num_layers - 1])

        # Final states: epilogue row-stores (off the recurrence chain).
        for l in range(num_layers):
            hn_ref[pl.ds(l, 1), :] = h[l]
            cn_ref[pl.ds(l, 1), :] = c[l]

        # Head + sigmoid on the last layer's (T, H) output, assembled as a
        # value (no VMEM scratch, no per-step stores).
        y = _rows_to_slab(y_rows, H)                               # (T, H) f32
        z = jnp.dot(y.astype(jnp.bfloat16), hw_ref[...],
                    preferred_element_type=jnp.float32) + hb_ref[...]
        out_ref[...] = jax.nn.sigmoid(z).astype(out_ref.dtype)

    return kernel


# -----------------------------------------------------------------------------
# One-time weight preparation (rec #1: cast outside the kernel, once).
# -----------------------------------------------------------------------------
def prepare_kernel_params(params):
    """Pre-cast slab-matmul weights (layer-0 W_ih, head W) to bf16; keep all
    recurrence-chain weights (W_hh, deeper W_ih) in f32."""
    kp = {"lstm": []}
    for l, p in enumerate(params["lstm"]):
        wih = p["wih_t"].astype(jnp.bfloat16) if l == 0 else p["wih_t"]
        kp["lstm"].append({"wih": wih, "whh": p["whh_t"], "b": p["b"]})
    kp["head_w"] = params["head_w_t"].astype(jnp.bfloat16)
    kp["head_b"] = params["head_b"]
    return kp


# -----------------------------------------------------------------------------
# Wrapper: StatefulLSTM1.forward (functional — state passed in / returned)
# -----------------------------------------------------------------------------
def stateful_lstm_forward(kparams, x, state=None):
    """Returns (sigmoid(head(lstm(x))), (hn, cn)) for 2D (T, input_size) x."""
    assert x.ndim == 2
    T = x.shape[0]
    L = len(kparams["lstm"])
    H = kparams["lstm"][0]["whh"].shape[0]
    O = kparams["head_w"].shape[1]

    if state is None:
        h0 = jnp.zeros((L, H), jnp.float32)
        c0 = jnp.zeros((L, H), jnp.float32)
    else:
        h0, c0 = state

    inputs = [x]
    for l in range(L):
        p = kparams["lstm"][l]
        inputs += [p["wih"], p["whh"], p["b"]]
    inputs += [h0, c0, kparams["head_w"], kparams["head_b"]]
    n_in = len(inputs)

    vmem = pl.BlockSpec(memory_space=pltpu.MemorySpace.VMEM)
    out, hn, cn = pl.pallas_call(
        _make_fused_kernel(L, T, H),
        out_shape=(
            jax.ShapeDtypeStruct((T, O), jnp.float32),   # model output
            jax.ShapeDtypeStruct((L, H), jnp.float32),   # hn
            jax.ShapeDtypeStruct((L, H), jnp.float32),   # cn
        ),
        in_specs=[vmem] * n_in,
        out_specs=(vmem, vmem, vmem),
        # h0 -> hn, c0 -> cn updated in place (P8); safe because the kernel
        # reads h0/c0 fully before any output write.
        input_output_aliases={n_in - 4: 1, n_in - 3: 2},
    )(*inputs)
    return out, (hn, cn)


# -----------------------------------------------------------------------------
# Parameter init (PyTorch-style shapes, uniform +-1/sqrt(H)), f32 canonical.
# -----------------------------------------------------------------------------
def init_params(key, input_size, hidden_size, output_size, num_layers):
    params = {"lstm": []}
    bound = 1.0 / jnp.sqrt(jnp.float32(hidden_size))
    for l in range(num_layers):
        in_sz = input_size if l == 0 else hidden_size
        key, k1, k2, k3, k4 = jax.random.split(key, 5)
        w_ih = jax.random.uniform(k1, (4 * hidden_size, in_sz), jnp.float32, -bound, bound)
        w_hh = jax.random.uniform(k2, (4 * hidden_size, hidden_size), jnp.float32, -bound, bound)
        b_ih = jax.random.uniform(k3, (4 * hidden_size,), jnp.float32, -bound, bound)
        b_hh = jax.random.uniform(k4, (4 * hidden_size,), jnp.float32, -bound, bound)
        params["lstm"].append({
            "wih_t": w_ih.T,                       # (in, 4H)
            "whh_t": w_hh.T,                       # (H, 4H)
            "b": (b_ih + b_hh).reshape(1, -1),     # (1, 4H)
        })
    key, k5, k6 = jax.random.split(key, 3)
    head_w = jax.random.uniform(k5, (output_size, hidden_size), jnp.float32, -bound, bound)
    head_b = jax.random.uniform(k6, (output_size,), jnp.float32, -bound, bound)
    params["head_w_t"] = head_w.T                  # (H, O)
    params["head_b"] = head_b.reshape(1, -1)       # (1, O)
    return params


# -----------------------------------------------------------------------------
# Pure-JAX references (for correctness checks only)
# -----------------------------------------------------------------------------
def ref_forward(params, x, state=None, mimic_kernel=True):
    """mimic_kernel=True matches the kernel's precision plan (bf16 layer-0
    input projection + bf16 head, f32 recurrence); False is full f32."""
    T = x.shape[0]
    L = len(params["lstm"])
    H = params["lstm"][0]["whh_t"].shape[0]
    if state is None:
        h0 = jnp.zeros((L, H), jnp.float32)
        c0 = jnp.zeros((L, H), jnp.float32)
    else:
        h0, c0 = state

    def mm_bf16(a, b):
        return jnp.dot(a.astype(jnp.bfloat16), b.astype(jnp.bfloat16),
                       preferred_element_type=jnp.float32)

    def mm_f32(a, b):
        return jnp.dot(a, b, precision=jax.lax.Precision.HIGHEST)

    layer_in = x
    hns, cns = [], []
    for l in range(L):
        p = params["lstm"][l]
        hl = h0[l:l + 1]
        cl = c0[l:l + 1]
        if mimic_kernel and l == 0:
            xw = mm_bf16(layer_in, p["wih_t"]) + p["b"]
        else:
            xw = mm_f32(layer_in, p["wih_t"]) + p["b"]
        outs = []
        for t in range(T):
            gates = xw[t:t + 1] + mm_f32(hl, p["whh_t"])
            i = jax.nn.sigmoid(gates[:, 0 * H:1 * H])
            f = jax.nn.sigmoid(gates[:, 1 * H:2 * H])
            g = jnp.tanh(gates[:, 2 * H:3 * H])
            o = jax.nn.sigmoid(gates[:, 3 * H:4 * H])
            cl = f * cl + i * g
            hl = o * jnp.tanh(cl)
            outs.append(hl)
        layer_in = jnp.concatenate(outs, axis=0)
        hns.append(hl)
        cns.append(cl)
    if mimic_kernel:
        z = mm_bf16(layer_in, params["head_w_t"]) + params["head_b"]
    else:
        z = mm_f32(layer_in, params["head_w_t"]) + params["head_b"]
    out = jax.nn.sigmoid(z)
    return out, (jnp.concatenate(hns, 0), jnp.concatenate(cns, 0))


# -----------------------------------------------------------------------------
if __name__ == "__main__":
    # Small shapes consistent with the module's forward (x is 2D: (seq, input)).
    T, INPUT, HIDDEN, OUTPUT, LAYERS = 8, 16, 32, 8, 2

    key = jax.random.PRNGKey(0)
    key, pkey, xkey = jax.random.split(key, 3)
    params = init_params(pkey, INPUT, HIDDEN, OUTPUT, LAYERS)
    kparams = prepare_kernel_params(params)        # one-time weight prep
    x = jax.random.normal(xkey, (T, INPUT), jnp.float32)

    # First forward (state=None, like a freshly reset module).
    out1, state1 = stateful_lstm_forward(kparams, x, state=None)
    # Second forward re-using the detached state, like the stateful module does.
    out2, state2 = stateful_lstm_forward(kparams, x, state=state1)
    jax.block_until_ready((out1, state1, out2, state2))

    # Structural check against a reference using the kernel's precision plan.
    ref1, rstate1 = ref_forward(params, x, None, mimic_kernel=True)
    ref2, _ = ref_forward(params, x, rstate1, mimic_kernel=True)
    assert jnp.allclose(out1, ref1, atol=1e-2, rtol=1e-2)
    assert jnp.allclose(out2, ref2, atol=1e-2, rtol=1e-2)
    assert jnp.allclose(state1[0], rstate1[0], atol=1e-2, rtol=1e-2)
    assert jnp.allclose(state1[1], rstate1[1], atol=1e-2, rtol=1e-2)

    # Sanity check against a full-f32 reference (recurrence is f32 in-kernel,
    # only the layer-0 input projection and head use bf16 MXU inputs).
    ref1_f32, rstate1_f32 = ref_forward(params, x, None, mimic_kernel=False)
    assert jnp.allclose(out1, ref1_f32, atol=5e-2, rtol=5e-2)
    assert jnp.allclose(state1[0], rstate1_f32[0], atol=5e-2, rtol=5e-2)

    assert out1.shape == (T, OUTPUT)
    assert state1[0].shape == (LAYERS, HIDDEN) and state1[1].shape == (LAYERS, HIDDEN)

    print("KERNEL_OK")
</pallas_src>

<mosaic_0001>
module attributes {stable_mosaic.version = 11 : i64} {
  func.func @kernel(%arg0: memref<8x16xf32, #tpu.memory_space<vmem>>, %arg1: memref<16x128xbf16, #tpu.memory_space<vmem>>, %arg2: memref<32x128xf32, #tpu.memory_space<vmem>>, %arg3: memref<1x128xf32, #tpu.memory_space<vmem>>, %arg4: memref<32x128xf32, #tpu.memory_space<vmem>>, %arg5: memref<32x128xf32, #tpu.memory_space<vmem>>, %arg6: memref<1x128xf32, #tpu.memory_space<vmem>>, %arg7: memref<2x32xf32, #tpu.memory_space<vmem>>, %arg8: memref<2x32xf32, #tpu.memory_space<vmem>>, %arg9: memref<32x8xbf16, #tpu.memory_space<vmem>>, %arg10: memref<1x8xf32, #tpu.memory_space<vmem>>, %arg11: memref<8x8xf32, #tpu.memory_space<vmem>>, %arg12: memref<2x32xf32, #tpu.memory_space<vmem>>, %arg13: memref<2x32xf32, #tpu.memory_space<vmem>>) attributes {dimension_semantics = [], scalar_prefetch = 0 : i64, scratch_operands = 0 : i64, tpu.core_type = #tpu.core_type<tc>} {
    %c0 = arith.constant 0 : index
    %c0_0 = arith.constant 0 : index
    %0 = vector.load %arg7[%c0, %c0_0] : memref<2x32xf32, #tpu.memory_space<vmem>>, vector<2x32xf32>
    %c0_1 = arith.constant 0 : index
    %c0_2 = arith.constant 0 : index
    %1 = vector.load %arg8[%c0_1, %c0_2] : memref<2x32xf32, #tpu.memory_space<vmem>>, vector<2x32xf32>
    %2 = vector.extract_strided_slice %0 {offsets = [0, 0], sizes = [1, 32], strides = [1, 1]} : vector<2x32xf32> to vector<1x32xf32>
    %3 = vector.extract_strided_slice %0 {offsets = [1, 0], sizes = [1, 32], strides = [1, 1]} : vector<2x32xf32> to vector<1x32xf32>
    %4 = vector.extract_strided_slice %1 {offsets = [0, 0], sizes = [1, 32], strides = [1, 1]} : vector<2x32xf32> to vector<1x32xf32>
    %5 = vector.extract_strided_slice %1 {offsets = [1, 0], sizes = [1, 32], strides = [1, 1]} : vector<2x32xf32> to vector<1x32xf32>
    %c0_3 = arith.constant 0 : index
    %c0_4 = arith.constant 0 : index
    %6 = vector.load %arg1[%c0_3, %c0_4] : memref<16x128xbf16, #tpu.memory_space<vmem>>, vector<16x128xbf16>
    %c0_5 = arith.constant 0 : index
    %c0_6 = arith.constant 0 : index
    %7 = vector.load %arg2[%c0_5, %c0_6] : memref<32x128xf32, #tpu.memory_space<vmem>>, vector<32x128xf32>
    %c0_7 = arith.constant 0 : index
    %c0_8 = arith.constant 0 : index
    %8 = vector.load %arg5[%c0_7, %c0_8] : memref<32x128xf32, #tpu.memory_space<vmem>>, vector<32x128xf32>
    %c0_9 = arith.constant 0 : index
    %c0_10 = arith.constant 0 : index
    %9 = vector.load %arg3[%c0_9, %c0_10] : memref<1x128xf32, #tpu.memory_space<vmem>>, vector<1x128xf32>
    %c0_11 = arith.constant 0 : index
    %c0_12 = arith.constant 0 : index
    %10 = vector.load %arg6[%c0_11, %c0_12] : memref<1x128xf32, #tpu.memory_space<vmem>>, vector<1x128xf32>
    %c0_13 = arith.constant 0 : index
    %c0_14 = arith.constant 0 : index
    %11 = vector.load %arg4[%c0_13, %c0_14] : memref<32x128xf32, #tpu.memory_space<vmem>>, vector<32x128xf32>
    %c0_15 = arith.constant 0 : index
    %c0_16 = arith.constant 0 : index
    %12 = vector.load %arg0[%c0_15, %c0_16] : memref<8x16xf32, #tpu.memory_space<vmem>>, vector<8x16xf32>
    %13 = arith.truncf %12 : vector<8x16xf32> to vector<8x16xbf16>
    %cst = arith.constant dense<0.000000e+00> : vector<8x128xf32>
    %14 = tpu.matmul %13, %6, %cst {dimension_numbers = #tpu.dot_dimension_numbers<[1], [0], [0], [1], [0, 0, 1, 1], [], []>} : vector<8x16xbf16>, vector<16x128xbf16>, vector<8x128xf32> -> vector<8x128xf32>
    %15 = vector.broadcast %9 : vector<1x128xf32> to vector<8x128xf32>
    %16 = arith.addf %14, %15 : vector<8x128xf32>
    %17 = vector.extract_strided_slice %16 {offsets = [0, 0], sizes = [1, 128], strides = [1, 1]} : vector<8x128xf32> to vector<1x128xf32>
    %cst_17 = arith.constant dense<0.000000e+00> : vector<1x128xf32>
    %18 = tpu.matmul %2, %7, %cst_17 {dimension_numbers = #tpu.dot_dimension_numbers<[1], [0], [0], [1], [0, 0, 1, 1], [], []>} : vector<1x32xf32>, vector<32x128xf32>, vector<1x128xf32> -> vector<1x128xf32>
    %19 = arith.addf %17, %18 : vector<1x128xf32>
    %20 = arith.negf %19 : vector<1x128xf32>
    %21 = math.exp %20 : vector<1x128xf32>
    %cst_18 = arith.constant 1.000000e+00 : f32
    %22 = vector.broadcast %cst_18 : f32 to vector<1x128xf32>
    %23 = arith.addf %22, %21 : vector<1x128xf32>
    %24 = arith.divf %22, %23 : vector<1x128xf32>
    %25 = vector.extract_strided_slice %19 {offsets = [0, 64], sizes = [1, 32], strides = [1, 1]} : vector<1x128xf32> to vector<1x32xf32>
    %26 = math.tanh %25 : vector<1x32xf32>
    %27 = vector.extract_strided_slice %24 {offsets = [0, 0], sizes = [1, 32], strides = [1, 1]} : vector<1x128xf32> to vector<1x32xf32>
    %28 = vector.extract_strided_slice %24 {offsets = [0, 32], sizes = [1, 32], strides = [1, 1]} : vector<1x128xf32> to vector<1x32xf32>
    %29 = vector.extract_strided_slice %24 {offsets = [0, 96], sizes = [1, 32], strides = [1, 1]} : vector<1x128xf32> to vector<1x32xf32>
    %30 = arith.mulf %28, %4 : vector<1x32xf32>
    %31 = arith.mulf %27, %26 : vector<1x32xf32>
    %32 = arith.addf %30, %31 : vector<1x32xf32>
    %33 = math.tanh %32 : vector<1x32xf32>
    %34 = arith.mulf %29, %33 : vector<1x32xf32>
    %cst_19 = arith.constant dense<0.000000e+00> : vector<1x128xf32>
    %35 = tpu.matmul %34, %11, %cst_19 {dimension_numbers = #tpu.dot_dimension_numbers<[1], [0], [0], [1], [0, 0, 1, 1], [], []>} : vector<1x32xf32>, vector<32x128xf32>, vector<1x128xf32> -> vector<1x128xf32>
    %cst_20 = arith.constant dense<0.000000e+00> : vector<1x128xf32>
    %36 = tpu.matmul %3, %8, %cst_20 {dimension_numbers = #tpu.dot_dimension_numbers<[1], [0], [0], [1], [0, 0, 1, 1], [], []>} : vector<1x32xf32>, vector<32x128xf32>, vector<1x128xf32> -> vector<1x128xf32>
    %37 = arith.addf %35, %36 : vector<1x128xf32>
    %38 = arith.addf %37, %10 : vector<1x128xf32>
    %39 = arith.negf %38 : vector<1x128xf32>
    %40 = math.exp %39 : vector<1x128xf32>
    %cst_21 = arith.constant 1.000000e+00 : f32
    %41 = vector.broadcast %cst_21 : f32 to vector<1x128xf32>
    %42 = arith.addf %41, %40 : vector<1x128xf32>
    %43 = arith.divf %41, %42 : vector<1x128xf32>
    %44 = vector.extract_strided_slice %38 {offsets = [0, 64], sizes = [1, 32], strides = [1, 1]} : vector<1x128xf32> to vector<1x32xf32>
    %45 = math.tanh %44 : vector<1x32xf32>
    %46 = vector.extract_strided_slice %43 {offsets = [0, 0], sizes = [1, 32], strides = [1, 1]} : vector<1x128xf32> to vector<1x32xf32>
    %47 = vector.extract_strided_slice %43 {offsets = [0, 32], sizes = [1, 32], strides = [1, 1]} : vector<1x128xf32> to vector<1x32xf32>
    %48 = vector.extract_strided_slice %43 {offsets = [0, 96], sizes = [1, 32], strides = [1, 1]} : vector<1x128xf32> to vector<1x32xf32>
    %49 = arith.mulf %47, %5 : vector<1x32xf32>
    %50 = arith.mulf %46, %45 : vector<1x32xf32>
    %51 = arith.addf %49, %50 : vector<1x32xf32>
    %52 = math.tanh %51 : vector<1x32xf32>
    %53 = arith.mulf %48, %52 : vector<1x32xf32>
    %54 = vector.extract_strided_slice %16 {offsets = [1, 0], sizes = [1, 128], strides = [1, 1]} : vector<8x128xf32> to vector<1x128xf32>
    %cst_22 = arith.constant dense<0.000000e+00> : vector<1x128xf32>
    %55 = tpu.matmul %34, %7, %cst_22 {dimension_numbers = #tpu.dot_dimension_numbers<[1], [0], [0], [1], [0, 0, 1, 1], [], []>} : vector<1x32xf32>, vector<32x128xf32>, vector<1x128xf32> -> vector<1x128xf32>
    %56 = arith.addf %54, %55 : vector<1x128xf32>
    %57 = arith.negf %56 : vector<1x128xf32>
    %58 = math.exp %57 : vector<1x128xf32>
    %cst_23 = arith.constant 1.000000e+00 : f32
    %59 = vector.broadcast %cst_23 : f32 to vector<1x128xf32>
    %60 = arith.addf %59, %58 : vector<1x128xf32>
    %61 = arith.divf %59, %60 : vector<1x128xf32>
    %62 = vector.extract_strided_slice %56 {offsets = [0, 64], sizes = [1, 32], strides = [1, 1]} : vector<1x128xf32> to vector<1x32xf32>
    %63 = math.tanh %62 : vector<1x32xf32>
    %64 = vector.extract_strided_slice %61 {offsets = [0, 0], sizes = [1, 32], strides = [1, 1]} : vector<1x128xf32> to vector<1x32xf32>
    %65 = vector.extract_strided_slice %61 {offsets = [0, 32], sizes = [1, 32], strides = [1, 1]} : vector<1x128xf32> to vector<1x32xf32>
    %66 = vector.extract_strided_slice %61 {offsets = [0, 96], sizes = [1, 32], strides = [1, 1]} : vector<1x128xf32> to vector<1x32xf32>
    %67 = arith.mulf %65, %32 : vector<1x32xf32>
    %68 = arith.mulf %64, %63 : vector<1x32xf32>
    %69 = arith.addf %67, %68 : vector<1x32xf32>
    %70 = math.tanh %69 : vector<1x32xf32>
    %71 = arith.mulf %66, %70 : vector<1x32xf32>
    %cst_24 = arith.constant dense<0.000000e+00> : vector<1x128xf32>
    %72 = tpu.matmul %71, %11, %cst_24 {dimension_numbers = #tpu.dot_dimension_numbers<[1], [0], [0], [1], [0, 0, 1, 1], [], []>} : vector<1x32xf32>, vector<32x128xf32>, vector<1x128xf32> -> vector<1x128xf32>
    %cst_25 = arith.constant dense<0.000000e+00> : vector<1x128xf32>
    %73 = tpu.matmul %53, %8, %cst_25 {dimension_numbers = #tpu.dot_dimension_numbers<[1], [0], [0], [1], [0, 0, 1, 1], [], []>} : vector<1x32xf32>, vector<32x128xf32>, vector<1x128xf32> -> vector<1x128xf32>
    %74 = arith.addf %72, %73 : vector<1x128xf32>
    %75 = arith.addf %74, %10 : vector<1x128xf32>
    %76 = arith.negf %75 : vector<1x128xf32>
    %77 = math.exp %76 : vector<1x128xf32>
    %cst_26 = arith.constant 1.000000e+00 : f32
    %78 = vector.broadcast %cst_26 : f32 to vector<1x128xf32>
    %79 = arith.addf %78, %77 : vector<1x128xf32>
    %80 = arith.divf %78, %79 : vector<1x128xf32>
    %81 = vector.extract_strided_slice %75 {offsets = [0, 64], sizes = [1, 32], strides = [1, 1]} : vector<1x128xf32> to vector<1x32xf32>
    %82 = math.tanh %81 : vector<1x32xf32>
    %83 = vector.extract_strided_slice %80 {offsets = [0, 0], sizes = [1, 32], strides = [1, 1]} : vector<1x128xf32> to vector<1x32xf32>
    %84 = vector.extract_strided_slice %80 {offsets = [0, 32], sizes = [1, 32], strides = [1, 1]} : vector<1x128xf32> to vector<1x32xf32>
    %85 = vector.extract_strided_slice %80 {offsets = [0, 96], sizes = [1, 32], strides = [1, 1]} : vector<1x128xf32> to vector<1x32xf32>
    %86 = arith.mulf %84, %51 : vector<1x32xf32>
    %87 = arith.mulf %83, %82 : vector<1x32xf32>
    %88 = arith.addf %86, %87 : vector<1x32xf32>
    %89 = math.tanh %88 : vector<1x32xf32>
    %90 = arith.mulf %85, %89 : vector<1x32xf32>
    %91 = vector.extract_strided_slice %16 {offsets = [2, 0], sizes = [1, 128], strides = [1, 1]} : vector<8x128xf32> to vector<1x128xf32>
    %cst_27 = arith.constant dense<0.000000e+00> : vector<1x128xf32>
    %92 = tpu.matmul %71, %7, %cst_27 {dimension_numbers = #tpu.dot_dimension_numbers<[1], [0], [0], [1], [0, 0, 1, 1], [], []>} : vector<1x32xf32>, vector<32x128xf32>, vector<1x128xf32> -> vector<1x128xf32>
    %93 = arith.addf %91, %92 : vector<1x128xf32>
    %94 = arith.negf %93 : vector<1x128xf32>
    %95 = math.exp %94 : vector<1x128xf32>
    %cst_28 = arith.constant 1.000000e+00 : f32
    %96 = vector.broadcast %cst_28 : f32 to vector<1x128xf32>
    %97 = arith.addf %96, %95 : vector<1x128xf32>
    %98 = arith.divf %96, %97 : vector<1x128xf32>
    %99 = vector.extract_strided_slice %93 {offsets = [0, 64], sizes = [1, 32], strides = [1, 1]} : vector<1x128xf32> to vector<1x32xf32>
    %100 = math.tanh %99 : vector<1x32xf32>
    %101 = vector.extract_strided_slice %98 {offsets = [0, 0], sizes = [1, 32], strides = [1, 1]} : vector<1x128xf32> to vector<1x32xf32>
    %102 = vector.extract_strided_slice %98 {offsets = [0, 32], sizes = [1, 32], strides = [1, 1]} : vector<1x128xf32> to vector<1x32xf32>
    %103 = vector.extract_strided_slice %98 {offsets = [0, 96], sizes = [1, 32], strides = [1, 1]} : vector<1x128xf32> to vector<1x32xf32>
    %104 = arith.mulf %102, %69 : vector<1x32xf32>
    %105 = arith.mulf %101, %100 : vector<1x32xf32>
    %106 = arith.addf %104, %105 : vector<1x32xf32>
    %107 = math.tanh %106 : vector<1x32xf32>
    %108 = arith.mulf %103, %107 : vector<1x32xf32>
    %cst_29 = arith.constant dense<0.000000e+00> : vector<1x128xf32>
    %109 = tpu.matmul %108, %11, %cst_29 {dimension_numbers = #tpu.dot_dimension_numbers<[1], [0], [0], [1], [0, 0, 1, 1], [], []>} : vector<1x32xf32>, vector<32x128xf32>, vector<1x128xf32> -> vector<1x128xf32>
    %cst_30 = arith.constant dense<0.000000e+00> : vector<1x128xf32>
    %110 = tpu.matmul %90, %8, %cst_30 {dimension_numbers = #tpu.dot_dimension_numbers<[1], [0], [0], [1], [0, 0, 1, 1], [], []>} : vector<1x32xf32>, vector<32x128xf32>, vector<1x128xf32> -> vector<1x128xf32>
    %111 = arith.addf %109, %110 : vector<1x128xf32>
    %112 = arith.addf %111, %10 : vector<1x128xf32>
    %113 = arith.negf %112 : vector<1x128xf32>
    %114 = math.exp %113 : vector<1x128xf32>
    %cst_31 = arith.constant 1.000000e+00 : f32
    %115 = vector.broadcast %cst_31 : f32 to vector<1x128xf32>
    %116 = arith.addf %115, %114 : vector<1x128xf32>
    %117 = arith.divf %115, %116 : vector<1x128xf32>
    %118 = vector.extract_strided_slice %112 {offsets = [0, 64], sizes = [1, 32], strides = [1, 1]} : vector<1x128xf32> to vector<1x32xf32>
    %119 = math.tanh %118 : vector<1x32xf32>
    %120 = vector.extract_strided_slice %117 {offsets = [0, 0], sizes = [1, 32], strides = [1, 1]} : vector<1x128xf32> to vector<1x32xf32>
    %121 = vector.extract_strided_slice %117 {offsets = [0, 32], sizes = [1, 32], strides = [1, 1]} : vector<1x128xf32> to vector<1x32xf32>
    %122 = vector.extract_strided_slice %117 {offsets = [0, 96], sizes = [1, 32], strides = [1, 1]} : vector<1x128xf32> to vector<1x32xf32>
    %123 = arith.mulf %121, %88 : vector<1x32xf32>
    %124 = arith.mulf %120, %119 : vector<1x32xf32>
    %125 = arith.addf %123, %124 : vector<1x32xf32>
    %126 = math.tanh %125 : vector<1x32xf32>
    %127 = arith.mulf %122, %126 : vector<1x32xf32>
    %128 = vector.extract_strided_slice %16 {offsets = [3, 0], sizes = [1, 128], strides = [1, 1]} : vector<8x128xf32> to vector<1x128xf32>
    %cst_32 = arith.constant dense<0.000000e+00> : vector<1x128xf32>
    %129 = tpu.matmul %108, %7, %cst_32 {dimension_numbers = #tpu.dot_dimension_numbers<[1], [0], [0], [1], [0, 0, 1, 1], [], []>} : vector<1x32xf32>, vector<32x128xf32>, vector<1x128xf32> -> vector<1x128xf32>
    %130 = arith.addf %128, %129 : vector<1x128xf32>
    %131 = arith.negf %130 : vector<1x128xf32>
    %132 = math.exp %131 : vector<1x128xf32>
    %cst_33 = arith.constant 1.000000e+00 : f32
    %133 = vector.broadcast %cst_33 : f32 to vector<1x128xf32>
    %134 = arith.addf %133, %132 : vector<1x128xf32>
    %135 = arith.divf %133, %134 : vector<1x128xf32>
    %136 = vector.extract_strided_slice %130 {offsets = [0, 64], sizes = [1, 32], strides = [1, 1]} : vector<1x128xf32> to vector<1x32xf32>
    %137 = math.tanh %136 : vector<1x32xf32>
    %138 = vector.extract_strided_slice %135 {offsets = [0, 0], sizes = [1, 32], strides = [1, 1]} : vector<1x128xf32> to vector<1x32xf32>
    %139 = vector.extract_strided_slice %135 {offsets = [0, 32], sizes = [1, 32], strides = [1, 1]} : vector<1x128xf32> to vector<1x32xf32>
    %140 = vector.extract_strided_slice %135 {offsets = [0, 96], sizes = [1, 32], strides = [1, 1]} : vector<1x128xf32> to vector<1x32xf32>
    %141 = arith.mulf %139, %106 : vector<1x32xf32>
    %142 = arith.mulf %138, %137 : vector<1x32xf32>
    %143 = arith.addf %141, %142 : vector<1x32xf32>
    %144 = math.tanh %143 : vector<1x32xf32>
    %145 = arith.mulf %140, %144 : vector<1x32xf32>
    %cst_34 = arith.constant dense<0.000000e+00> : vector<1x128xf32>
    %146 = tpu.matmul %145, %11, %cst_34 {dimension_numbers = #tpu.dot_dimension_numbers<[1], [0], [0], [1], [0, 0, 1, 1], [], []>} : vector<1x32xf32>, vector<32x128xf32>, vector<1x128xf32> -> vector<1x128xf32>
    %cst_35 = arith.constant dense<0.000000e+00> : vector<1x128xf32>
    %147 = tpu.matmul %127, %8, %cst_35 {dimension_numbers = #tpu.dot_dimension_numbers<[1], [0], [0], [1], [0, 0, 1, 1], [], []>} : vector<1x32xf32>, vector<32x128xf32>, vector<1x128xf32> -> vector<1x128xf32>
    %148 = arith.addf %146, %147 : vector<1x128xf32>
    %149 = arith.addf %148, %10 : vector<1x128xf32>
    %150 = arith.negf %149 : vector<1x128xf32>
    %151 = math.exp %150 : vector<1x128xf32>
    %cst_36 = arith.constant 1.000000e+00 : f32
    %152 = vector.broadcast %cst_36 : f32 to vector<1x128xf32>
    %153 = arith.addf %152, %151 : vector<1x128xf32>
    %154 = arith.divf %152, %153 : vector<1x128xf32>
    %155 = vector.extract_strided_slice %149 {offsets = [0, 64], sizes = [1, 32], strides = [1, 1]} : vector<1x128xf32> to vector<1x32xf32>
    %156 = math.tanh %155 : vector<1x32xf32>
    %157 = vector.extract_strided_slice %154 {offsets = [0, 0], sizes = [1, 32], strides = [1, 1]} : vector<1x128xf32> to vector<1x32xf32>
    %158 = vector.extract_strided_slice %154 {offsets = [0, 32], sizes = [1, 32], strides = [1, 1]} : vector<1x128xf32> to vector<1x32xf32>
    %159 = vector.extract_strided_slice %154 {offsets = [0, 96], sizes = [1, 32], strides = [1, 1]} : vector<1x128xf32> to vector<1x32xf32>
    %160 = arith.mulf %158, %125 : vector<1x32xf32>
    %161 = arith.mulf %157, %156 : vector<1x32xf32>
    %162 = arith.addf %160, %161 : vector<1x32xf32>
    %163 = math.tanh %162 : vector<1x32xf32>
    %164 = arith.mulf %159, %163 : vector<1x32xf32>
    %165 = vector.extract_strided_slice %16 {offsets = [4, 0], sizes = [1, 128], strides = [1, 1]} : vector<8x128xf32> to vector<1x128xf32>
    %cst_37 = arith.constant dense<0.000000e+00> : vector<1x128xf32>
    %166 = tpu.matmul %145, %7, %cst_37 {dimension_numbers = #tpu.dot_dimension_numbers<[1], [0], [0], [1], [0, 0, 1, 1], [], []>} : vector<1x32xf32>, vector<32x128xf32>, vector<1x128xf32> -> vector<1x128xf32>
    %167 = arith.addf %165, %166 : vector<1x128xf32>
    %168 = arith.negf %167 : vector<1x128xf32>
    %169 = math.exp %168 : vector<1x128xf32>
    %cst_38 = arith.constant 1.000000e+00 : f32
    %170 = vector.broadcast %cst_38 : f32 to vector<1x128xf32>
    %171 = arith.addf %170, %169 : vector<1x128xf32>
    %172 = arith.divf %170, %171 : vector<1x128xf32>
    %173 = vector.extract_strided_slice %167 {offsets = [0, 64], sizes = [1, 32], strides = [1, 1]} : vector<1x128xf32> to vector<1x32xf32>
    %174 = math.tanh %173 : vector<1x32xf32>
    %175 = vector.extract_strided_slice %172 {offsets = [0, 0], sizes = [1, 32], strides = [1, 1]} : vector<1x128xf32> to vector<1x32xf32>
    %176 = vector.extract_strided_slice %172 {offsets = [0, 32], sizes = [1, 32], strides = [1, 1]} : vector<1x128xf32> to vector<1x32xf32>
    %177 = vector.extract_strided_slice %172 {offsets = [0, 96], sizes = [1, 32], strides = [1, 1]} : vector<1x128xf32> to vector<1x32xf32>
    %178 = arith.mulf %176, %143 : vector<1x32xf32>
    %179 = arith.mulf %175, %174 : vector<1x32xf32>
    %180 = arith.addf %178, %179 : vector<1x32xf32>
    %181 = math.tanh %180 : vector<1x32xf32>
    %182 = arith.mulf %177, %181 : vector<1x32xf32>
    %cst_39 = arith.constant dense<0.000000e+00> : vector<1x128xf32>
    %183 = tpu.matmul %182, %11, %cst_39 {dimension_numbers = #tpu.dot_dimension_numbers<[1], [0], [0], [1], [0, 0, 1, 1], [], []>} : vector<1x32xf32>, vector<32x128xf32>, vector<1x128xf32> -> vector<1x128xf32>
    %cst_40 = arith.constant dense<0.000000e+00> : vector<1x128xf32>
    %184 = tpu.matmul %164, %8, %cst_40 {dimension_numbers = #tpu.dot_dimension_numbers<[1], [0], [0], [1], [0, 0, 1, 1], [], []>} : vector<1x32xf32>, vector<32x128xf32>, vector<1x128xf32> -> vector<1x128xf32>
    %185 = arith.addf %183, %184 : vector<1x128xf32>
    %186 = arith.addf %185, %10 : vector<1x128xf32>
    %187 = arith.negf %186 : vector<1x128xf32>
    %188 = math.exp %187 : vector<1x128xf32>
    %cst_41 = arith.constant 1.000000e+00 : f32
    %189 = vector.broadcast %cst_41 : f32 to vector<1x128xf32>
    %190 = arith.addf %189, %188 : vector<1x128xf32>
    %191 = arith.divf %189, %190 : vector<1x128xf32>
    %192 = vector.extract_strided_slice %186 {offsets = [0, 64], sizes = [1, 32], strides = [1, 1]} : vector<1x128xf32> to vector<1x32xf32>
    %193 = math.tanh %192 : vector<1x32xf32>
    %194 = vector.extract_strided_slice %191 {offsets = [0, 0], sizes = [1, 32], strides = [1, 1]} : vector<1x128xf32> to vector<1x32xf32>
    %195 = vector.extract_strided_slice %191 {offsets = [0, 32], sizes = [1, 32], strides = [1, 1]} : vector<1x128xf32> to vector<1x32xf32>
    %196 = vector.extract_strided_slice %191 {offsets = [0, 96], sizes = [1, 32], strides = [1, 1]} : vector<1x128xf32> to vector<1x32xf32>
    %197 = arith.mulf %195, %162 : vector<1x32xf32>
    %198 = arith.mulf %194, %193 : vector<1x32xf32>
    %199 = arith.addf %197, %198 : vector<1x32xf32>
    %200 = math.tanh %199 : vector<1x32xf32>
    %201 = arith.mulf %196, %200 : vector<1x32xf32>
    %202 = vector.extract_strided_slice %16 {offsets = [5, 0], sizes = [1, 128], strides = [1, 1]} : vector<8x128xf32> to vector<1x128xf32>
    %cst_42 = arith.constant dense<0.000000e+00> : vector<1x128xf32>
    %203 = tpu.matmul %182, %7, %cst_42 {dimension_numbers = #tpu.dot_dimension_numbers<[1], [0], [0], [1], [0, 0, 1, 1], [], []>} : vector<1x32xf32>, vector<32x128xf32>, vector<1x128xf32> -> vector<1x128xf32>
    %204 = arith.addf %202, %203 : vector<1x128xf32>
    %205 = arith.negf %204 : vector<1x128xf32>
    %206 = math.exp %205 : vector<1x128xf32>
    %cst_43 = arith.constant 1.000000e+00 : f32
    %207 = vector.broadcast %cst_43 : f32 to vector<1x128xf32>
    %208 = arith.addf %207, %206 : vector<1x128xf32>
    %209 = arith.divf %207, %208 : vector<1x128xf32>
    %210 = vector.extract_strided_slice %204 {offsets = [0, 64], sizes = [1, 32], strides = [1, 1]} : vector<1x128xf32> to vector<1x32xf32>
    %211 = math.tanh %210 : vector<1x32xf32>
    %212 = vector.extract_strided_slice %209 {offsets = [0, 0], sizes = [1, 32], strides = [1, 1]} : vector<1x128xf32> to vector<1x32xf32>
    %213 = vector.extract_strided_slice %209 {offsets = [0, 32], sizes = [1, 32], strides = [1, 1]} : vector<1x128xf32> to vector<1x32xf32>
    %214 = vector.extract_strided_slice %209 {offsets = [0, 96], sizes = [1, 32], strides = [1, 1]} : vector<1x128xf32> to vector<1x32xf32>
    %215 = arith.mulf %213, %180 : vector<1x32xf32>
    %216 = arith.mulf %212, %211 : vector<1x32xf32>
    %217 = arith.addf %215, %216 : vector<1x32xf32>
    %218 = math.tanh %217 : vector<1x32xf32>
    %219 = arith.mulf %214, %218 : vector<1x32xf32>
    %cst_44 = arith.constant dense<0.000000e+00> : vector<1x128xf32>
    %220 = tpu.matmul %219, %11, %cst_44 {dimension_numbers = #tpu.dot_dimension_numbers<[1], [0], [0], [1], [0, 0, 1, 1], [], []>} : vector<1x32xf32>, vector<32x128xf32>, vector<1x128xf32> -> vector<1x128xf32>
    %cst_45 = arith.constant dense<0.000000e+00> : vector<1x128xf32>
    %221 = tpu.matmul %201, %8, %cst_45 {dimension_numbers = #tpu.dot_dimension_numbers<[1], [0], [0], [1], [0, 0, 1, 1], [], []>} : vector<1x32xf32>, vector<32x128xf32>, vector<1x128xf32> -> vector<1x128xf32>
    %222 = arith.addf %220, %221 : vector<1x128xf32>
    %223 = arith.addf %222, %10 : vector<1x128xf32>
    %224 = arith.negf %223 : vector<1x128xf32>
    %225 = math.exp %224 : vector<1x128xf32>
    %cst_46 = arith.constant 1.000000e+00 : f32
    %226 = vector.broadcast %cst_46 : f32 to vector<1x128xf32>
    %227 = arith.addf %226, %225 : vector<1x128xf32>
    %228 = arith.divf %226, %227 : vector<1x128xf32>
    %229 = vector.extract_strided_slice %223 {offsets = [0, 64], sizes = [1, 32], strides = [1, 1]} : vector<1x128xf32> to vector<1x32xf32>
    %230 = math.tanh %229 : vector<1x32xf32>
    %231 = vector.extract_strided_slice %228 {offsets = [0, 0], sizes = [1, 32], strides = [1, 1]} : vector<1x128xf32> to vector<1x32xf32>
    %232 = vector.extract_strided_slice %228 {offsets = [0, 32], sizes = [1, 32], strides = [1, 1]} : vector<1x128xf32> to vector<1x32xf32>
    %233 = vector.extract_strided_slice %228 {offsets = [0, 96], sizes = [1, 32], strides = [1, 1]} : vector<1x128xf32> to vector<1x32xf32>
    %234 = arith.mulf %232, %199 : vector<1x32xf32>
    %235 = arith.mulf %231, %230 : vector<1x32xf32>
    %236 = arith.addf %234, %235 : vector<1x32xf32>
    %237 = math.tanh %236 : vector<1x32xf32>
    %238 = arith.mulf %233, %237 : vector<1x32xf32>
    %239 = vector.extract_strided_slice %16 {offsets = [6, 0], sizes = [1, 128], strides = [1, 1]} : vector<8x128xf32> to vector<1x128xf32>
    %cst_47 = arith.constant dense<0.000000e+00> : vector<1x128xf32>
    %240 = tpu.matmul %219, %7, %cst_47 {dimension_numbers = #tpu.dot_dimension_numbers<[1], [0], [0], [1], [0, 0, 1, 1], [], []>} : vector<1x32xf32>, vector<32x128xf32>, vector<1x128xf32> -> vector<1x128xf32>
    %241 = arith.addf %239, %240 : vector<1x128xf32>
    %242 = arith.negf %241 : vector<1x128xf32>
    %243 = math.exp %242 : vector<1x128xf32>
    %cst_48 = arith.constant 1.000000e+00 : f32
    %244 = vector.broadcast %cst_48 : f32 to vector<1x128xf32>
    %245 = arith.addf %244, %243 : vector<1x128xf32>
    %246 = arith.divf %244, %245 : vector<1x128xf32>
    %247 = vector.extract_strided_slice %241 {offsets = [0, 64], sizes = [1, 32], strides = [1, 1]} : vector<1x128xf32> to vector<1x32xf32>
    %248 = math.tanh %247 : vector<1x32xf32>
    %249 = vector.extract_strided_slice %246 {offsets = [0, 0], sizes = [1, 32], strides = [1, 1]} : vector<1x128xf32> to vector<1x32xf32>
    %250 = vector.extract_strided_slice %246 {offsets = [0, 32], sizes = [1, 32], strides = [1, 1]} : vector<1x128xf32> to vector<1x32xf32>
    %251 = vector.extract_strided_slice %246 {offsets = [0, 96], sizes = [1, 32], strides = [1, 1]} : vector<1x128xf32> to vector<1x32xf32>
    %252 = arith.mulf %250, %217 : vector<1x32xf32>
    %253 = arith.mulf %249, %248 : vector<1x32xf32>
    %254 = arith.addf %252, %253 : vector<1x32xf32>
    %255 = math.tanh %254 : vector<1x32xf32>
    %256 = arith.mulf %251, %255 : vector<1x32xf32>
    %cst_49 = arith.constant dense<0.000000e+00> : vector<1x128xf32>
    %257 = tpu.matmul %256, %11, %cst_49 {dimension_numbers = #tpu.dot_dimension_numbers<[1], [0], [0], [1], [0, 0, 1, 1], [], []>} : vector<1x32xf32>, vector<32x128xf32>, vector<1x128xf32> -> vector<1x128xf32>
    %cst_50 = arith.constant dense<0.000000e+00> : vector<1x128xf32>
    %258 = tpu.matmul %238, %8, %cst_50 {dimension_numbers = #tpu.dot_dimension_numbers<[1], [0], [0], [1], [0, 0, 1, 1], [], []>} : vector<1x32xf32>, vector<32x128xf32>, vector<1x128xf32> -> vector<1x128xf32>
    %259 = arith.addf %257, %258 : vector<1x128xf32>
    %260 = arith.addf %259, %10 : vector<1x128xf32>
    %261 = arith.negf %260 : vector<1x128xf32>
    %262 = math.exp %261 : vector<1x128xf32>
    %cst_51 = arith.constant 1.000000e+00 : f32
    %263 = vector.broadcast %cst_51 : f32 to vector<1x128xf32>
    %264 = arith.addf %263, %262 : vector<1x128xf32>
    %265 = arith.divf %263, %264 : vector<1x128xf32>
    %266 = vector.extract_strided_slice %260 {offsets = [0, 64], sizes = [1, 32], strides = [1, 1]} : vector<1x128xf32> to vector<1x32xf32>
    %267 = math.tanh %266 : vector<1x32xf32>
    %268 = vector.extract_strided_slice %265 {offsets = [0, 0], sizes = [1, 32], strides = [1, 1]} : vector<1x128xf32> to vector<1x32xf32>
    %269 = vector.extract_strided_slice %265 {offsets = [0, 32], sizes = [1, 32], strides = [1, 1]} : vector<1x128xf32> to vector<1x32xf32>
    %270 = vector.extract_strided_slice %265 {offsets = [0, 96], sizes = [1, 32], strides = [1, 1]} : vector<1x128xf32> to vector<1x32xf32>
    %271 = arith.mulf %269, %236 : vector<1x32xf32>
    %272 = arith.mulf %268, %267 : vector<1x32xf32>
    %273 = arith.addf %271, %272 : vector<1x32xf32>
    %274 = math.tanh %273 : vector<1x32xf32>
    %275 = arith.mulf %270, %274 : vector<1x32xf32>
    %276 = vector.extract_strided_slice %16 {offsets = [7, 0], sizes = [1, 128], strides = [1, 1]} : vector<8x128xf32> to vector<1x128xf32>
    %cst_52 = arith.constant dense<0.000000e+00> : vector<1x128xf32>
    %277 = tpu.matmul %256, %7, %cst_52 {dimension_numbers = #tpu.dot_dimension_numbers<[1], [0], [0], [1], [0, 0, 1, 1], [], []>} : vector<1x32xf32>, vector<32x128xf32>, vector<1x128xf32> -> vector<1x128xf32>
    %278 = arith.addf %276, %277 : vector<1x128xf32>
    %279 = arith.negf %278 : vector<1x128xf32>
    %280 = math.exp %279 : vector<1x128xf32>
    %cst_53 = arith.constant 1.000000e+00 : f32
    %281 = vector.broadcast %cst_53 : f32 to vector<1x128xf32>
    %282 = arith.addf %281, %280 : vector<1x128xf32>
    %283 = arith.divf %281, %282 : vector<1x128xf32>
    %284 = vector.extract_strided_slice %278 {offsets = [0, 64], sizes = [1, 32], strides = [1, 1]} : vector<1x128xf32> to vector<1x32xf32>
    %285 = math.tanh %284 : vector<1x32xf32>
    %286 = vector.extract_strided_slice %283 {offsets = [0, 0], sizes = [1, 32], strides = [1, 1]} : vector<1x128xf32> to vector<1x32xf32>
    %287 = vector.extract_strided_slice %283 {offsets = [0, 32], sizes = [1, 32], strides = [1, 1]} : vector<1x128xf32> to vector<1x32xf32>
    %288 = vector.extract_strided_slice %283 {offsets = [0, 96], sizes = [1, 32], strides = [1, 1]} : vector<1x128xf32> to vector<1x32xf32>
    %289 = arith.mulf %287, %254 : vector<1x32xf32>
    %290 = arith.mulf %286, %285 : vector<1x32xf32>
    %291 = arith.addf %289, %290 : vector<1x32xf32>
    %292 = math.tanh %291 : vector<1x32xf32>
    %293 = arith.mulf %288, %292 : vector<1x32xf32>
    %cst_54 = arith.constant dense<0.000000e+00> : vector<1x128xf32>
    %294 = tpu.matmul %293, %11, %cst_54 {dimension_numbers = #tpu.dot_dimension_numbers<[1], [0], [0], [1], [0, 0, 1, 1], [], []>} : vector<1x32xf32>, vector<32x128xf32>, vector<1x128xf32> -> vector<1x128xf32>
    %cst_55 = arith.constant dense<0.000000e+00> : vector<1x128xf32>
    %295 = tpu.matmul %275, %8, %cst_55 {dimension_numbers = #tpu.dot_dimension_numbers<[1], [0], [0], [1], [0, 0, 1, 1], [], []>} : vector<1x32xf32>, vector<32x128xf32>, vector<1x128xf32> -> vector<1x128xf32>
    %296 = arith.addf %294, %295 : vector<1x128xf32>
    %297 = arith.addf %296, %10 : vector<1x128xf32>
    %298 = arith.negf %297 : vector<1x128xf32>
    %299 = math.exp %298 : vector<1x128xf32>
    %cst_56 = arith.constant 1.000000e+00 : f32
    %300 = vector.broadcast %cst_56 : f32 to vector<1x128xf32>
    %301 = arith.addf %300, %299 : vector<1x128xf32>
    %302 = arith.divf %300, %301 : vector<1x128xf32>
    %303 = vector.extract_strided_slice %297 {offsets = [0, 64], sizes = [1, 32], strides = [1, 1]} : vector<1x128xf32> to vector<1x32xf32>
    %304 = math.tanh %303 : vector<1x32xf32>
    %305 = vector.extract_strided_slice %302 {offsets = [0, 0], sizes = [1, 32], strides = [1, 1]} : vector<1x128xf32> to vector<1x32xf32>
    %306 = vector.extract_strided_slice %302 {offsets = [0, 32], sizes = [1, 32], strides = [1, 1]} : vector<1x128xf32> to vector<1x32xf32>
    %307 = vector.extract_strided_slice %302 {offsets = [0, 96], sizes = [1, 32], strides = [1, 1]} : vector<1x128xf32> to vector<1x32xf32>
    %308 = arith.mulf %306, %273 : vector<1x32xf32>
    %309 = arith.mulf %305, %304 : vector<1x32xf32>
    %310 = arith.addf %308, %309 : vector<1x32xf32>
    %311 = math.tanh %310 : vector<1x32xf32>
    %312 = arith.mulf %307, %311 : vector<1x32xf32>
    %c0_57 = arith.constant 0 : index
    %c0_58 = arith.constant 0 : index
    %313 = vector.load %arg12[%c0_57, %c0_58] : memref<2x32xf32, #tpu.memory_space<vmem>>, vector<1x32xf32>
    tpu.vector_store %arg12[%c0_57, %c0_58], %293 {strides = array<i32>} : memref<2x32xf32, #tpu.memory_space<vmem>>, vector<1x32xf32>,
    %c0_59 = arith.constant 0 : index
    %c0_60 = arith.constant 0 : index
    %314 = vector.load %arg13[%c0_59, %c0_60] : memref<2x32xf32, #tpu.memory_space<vmem>>, vector<1x32xf32>
    tpu.vector_store %arg13[%c0_59, %c0_60], %291 {strides = array<i32>} : memref<2x32xf32, #tpu.memory_space<vmem>>, vector<1x32xf32>,
    %c1 = arith.constant 1 : index
    %c0_61 = arith.constant 0 : index
    %315 = vector.load %arg12[%c1, %c0_61] : memref<2x32xf32, #tpu.memory_space<vmem>>, vector<1x32xf32>
    tpu.vector_store %arg12[%c1, %c0_61], %312 {strides = array<i32>} : memref<2x32xf32, #tpu.memory_space<vmem>>, vector<1x32xf32>,
    %c1_62 = arith.constant 1 : index
    %c0_63 = arith.constant 0 : index
    %316 = vector.load %arg13[%c1_62, %c0_63] : memref<2x32xf32, #tpu.memory_space<vmem>>, vector<1x32xf32>
    tpu.vector_store %arg13[%c1_62, %c0_63], %310 {strides = array<i32>} : memref<2x32xf32, #tpu.memory_space<vmem>>, vector<1x32xf32>,
    %317 = tpu.iota {dimensions = array<i32: 0>} : vector<8x32xi32>
    %cst_64 = arith.constant 0.000000e+00 : f32
    %318 = vector.broadcast %cst_64 : f32 to vector<8x32xf32>
    %c0_i32 = arith.constant 0 : i32
    %319 = vector.broadcast %c0_i32 : i32 to vector<8x32xi32>
    %320 = arith.cmpi eq, %317, %319 : vector<8x32xi32>
    %321 = vector.shape_cast %53 : vector<1x32xf32> to vector<1x32xf32>
    %322 = vector.broadcast %321 : vector<1x32xf32> to vector<8x32xf32>
    %323 = arith.select %320, %322, %318 : vector<8x32xi1>, vector<8x32xf32>
    %c1_i32 = arith.constant 1 : i32
    %324 = vector.broadcast %c1_i32 : i32 to vector<8x32xi32>
    %325 = arith.cmpi eq, %317, %324 : vector<8x32xi32>
    %326 = vector.shape_cast %90 : vector<1x32xf32> to vector<1x32xf32>
    %327 = vector.broadcast %326 : vector<1x32xf32> to vector<8x32xf32>
    %328 = arith.select %325, %327, %323 : vector<8x32xi1>, vector<8x32xf32>
    %c2_i32 = arith.constant 2 : i32
    %329 = vector.broadcast %c2_i32 : i32 to vector<8x32xi32>
    %330 = arith.cmpi eq, %317, %329 : vector<8x32xi32>
    %331 = vector.shape_cast %127 : vector<1x32xf32> to vector<1x32xf32>
    %332 = vector.broadcast %331 : vector<1x32xf32> to vector<8x32xf32>
    %333 = arith.select %330, %332, %328 : vector<8x32xi1>, vector<8x32xf32>
    %c3_i32 = arith.constant 3 : i32
    %334 = vector.broadcast %c3_i32 : i32 to vector<8x32xi32>
    %335 = arith.cmpi eq, %317, %334 : vector<8x32xi32>
    %336 = vector.shape_cast %164 : vector<1x32xf32> to vector<1x32xf32>
    %337 = vector.broadcast %336 : vector<1x32xf32> to vector<8x32xf32>
    %338 = arith.select %335, %337, %333 : vector<8x32xi1>, vector<8x32xf32>
    %c4_i32 = arith.constant 4 : i32
    %339 = vector.broadcast %c4_i32 : i32 to vector<8x32xi32>
    %340 = arith.cmpi eq, %317, %339 : vector<8x32xi32>
    %341 = vector.shape_cast %201 : vector<1x32xf32> to vector<1x32xf32>
    %342 = vector.broadcast %341 : vector<1x32xf32> to vector<8x32xf32>
    %343 = arith.select %340, %342, %338 : vector<8x32xi1>, vector<8x32xf32>
    %c5_i32 = arith.constant 5 : i32
    %344 = vector.broadcast %c5_i32 : i32 to vector<8x32xi32>
    %345 = arith.cmpi eq, %317, %344 : vector<8x32xi32>
    %346 = vector.shape_cast %238 : vector<1x32xf32> to vector<1x32xf32>
    %347 = vector.broadcast %346 : vector<1x32xf32> to vector<8x32xf32>
    %348 = arith.select %345, %347, %343 : vector<8x32xi1>, vector<8x32xf32>
    %c6_i32 = arith.constant 6 : i32
    %349 = vector.broadcast %c6_i32 : i32 to vector<8x32xi32>
    %350 = arith.cmpi eq, %317, %349 : vector<8x32xi32>
    %351 = vector.shape_cast %275 : vector<1x32xf32> to vector<1x32xf32>
    %352 = vector.broadcast %351 : vector<1x32xf32> to vector<8x32xf32>
    %353 = arith.select %350, %352, %348 : vector<8x32xi1>, vector<8x32xf32>
    %c7_i32 = arith.constant 7 : i32
    %354 = vector.broadcast %c7_i32 : i32 to vector<8x32xi32>
    %355 = arith.cmpi eq, %317, %354 : vector<8x32xi32>
    %356 = vector.shape_cast %312 : vector<1x32xf32> to vector<1x32xf32>
    %357 = vector.broadcast %356 : vector<1x32xf32> to vector<8x32xf32>
    %358 = arith.select %355, %357, %353 : vector<8x32xi1>, vector<8x32xf32>
    %359 = arith.truncf %358 : vector<8x32xf32> to vector<8x32xbf16>
    %c0_65 = arith.constant 0 : index
    %c0_66 = arith.constant 0 : index
    %360 = vector.load %arg9[%c0_65, %c0_66] : memref<32x8xbf16, #tpu.memory_space<vmem>>, vector<32x8xbf16>
    %cst_67 = arith.constant dense<0.000000e+00> : vector<8x8xf32>
    %361 = tpu.matmul %359, %360, %cst_67 {dimension_numbers = #tpu.dot_dimension_numbers<[1], [0], [0], [1], [0, 0, 1, 1], [], []>} : vector<8x32xbf16>, vector<32x8xbf16>, vector<8x8xf32> -> vector<8x8xf32>
    %c0_68 = arith.constant 0 : index
    %c0_69 = arith.constant 0 : index
    %362 = vector.load %arg10[%c0_68, %c0_69] : memref<1x8xf32, #tpu.memory_space<vmem>>, vector<1x8xf32>
    %363 = vector.broadcast %362 : vector<1x8xf32> to vector<8x8xf32>
    %364 = arith.addf %361, %363 : vector<8x8xf32>
    %365 = arith.negf %364 : vector<8x8xf32>
    %366 = math.exp %365 : vector<8x8xf32>
    %cst_70 = arith.constant 1.000000e+00 : f32
    %367 = vector.broadcast %cst_70 : f32 to vector<8x8xf32>
    %368 = arith.addf %367, %366 : vector<8x8xf32>
    %369 = arith.divf %367, %368 : vector<8x8xf32>
    %c0_71 = arith.constant 0 : index
    %c0_72 = arith.constant 0 : index
    %370 = vector.load %arg11[%c0_71, %c0_72] : memref<8x8xf32, #tpu.memory_space<vmem>>, vector<8x8xf32>
    tpu.vector_store %arg11[%c0_71, %c0_72], %369 {strides = array<i32>} : memref<8x8xf32, #tpu.memory_space<vmem>>, vector<8x8xf32>,
    return
  }
}

</mosaic_0001>

<bundles_post_ra>
// kernel: tpu_custom_call.1
= control target key start
LH: loop header
LB: loop body
LE: loop exit
PB: predicated region body
PF: predicated region fallthrough
CT: control target
= control target key end

     0   :  { %19 = vsyncpa [#allocation3], 0  ;;  %s4059_s0 = inlined_call_operand.vmem [shape: f32[8,16], index: 0, kind: input, shape index: {}]   ;;  %s4060_s1 = inlined_call_operand.hbm [shape: bf16[16,128], index: 1, kind: input, shape index: {}]   ;;  %s4061_s2 = inlined_call_operand.vmem [shape: f32[32,128], index: 2, kind: input, shape index: {}]   ;;  %s4062_s3 = inlined_call_operand.vmem [shape: f32[1,128], index: 3, kind: input, shape index: {}]   ;;  %s4063_s4 = inlined_call_operand.hbm [shape: f32[32,128], index: 4, kind: input, shape index: {}]   ;;  %s4064_s5 = inlined_call_operand.hbm [shape: f32[32,128], index: 5, kind: input, shape index: {}]   ;;  %s4065_s6 = inlined_call_operand.vmem [shape: f32[1,128], index: 6, kind: input, shape index: {}]   ;;  %s4066_s7 = inlined_call_operand.hbm [shape: f32[2,32], index: 7, kind: input, shape index: {}, may-alias: {7,12}]   ;;  %s4067_s8 = inlined_call_operand.hbm [shape: f32[2,32], index: 8, kind: input, shape index: {}, may-alias: {8,13}]   ;;  %s4068_s9 = inlined_call_operand.vmem [shape: bf16[32,8], index: 9, kind: input, shape index: {}]   ;;  %s4069_s10 = inlined_call_operand.hbm [shape: f32[1,8], index: 10, kind: input, shape index: {}]   ;;  %s4070_s11 = inlined_call_operand.hbm [shape: f32[8,8], index: 11, kind: output, shape index: {0}]   ;;  %s4071_s12 = inlined_call_operand.hbm [shape: f32[2,32], index: 12, kind: output, shape index: {1}, may-alias: {7,12}]   ;;  %s4072_s13 = inlined_call_operand.hbm [shape: f32[2,32], index: 13, kind: output, shape index: {2}, may-alias: {8,13}]  }
   0x1   :  { %20 = vsyncpa [#allocation6], 0 }
   0x2   :  { %21 = vsyncpa [#allocation9], 0 }
   0x3   :  { %22 = vsyncpa [#allocation12], 0 }
   0x4   :  { %23 = vsyncpa [#allocation4], 0 }
   0x5   :  { %24 = vsyncpa [#allocation15], 0  ;;  %s3417_s25 = smov [#allocation5]  }
   0x6   :  { %s48_s26 = sshll.u32 %s3417_s25, 4  ;;  %s49_s26 = int_to_ptr.vmem [resolvable:$true] %s48_s26 }
   0x7   :  { %s3233_s27 = scalar_lea.vmem %s49_s26, 512  ;;  %p3238_p1 = scmp.lt.s32.totalorder %s49_s26, %s49_s26 }
   0x8   :  { %p3234_p0 = scmp.ne.s32.totalorder %s49_s26, %s3233_s27  ;;  %p3239_p2 = scmp.lt.s32.totalorder %s3233_s27, %s3233_s27 }
   0xa   :  { %p3240_p3 = por %p3239_p2, %p3238_p1 }
   0xc   :  { %p3241_p4 = pnand %p3240_p3, %p3234_p0 }
   0xe   :  { %3244 = shalt.err (!%p3241_p4)
}
   0xf   :  { %s3418_s28 = smov 128   ;;  %s3419_s29 = smov 8  }
  0x10   :  { %54 = dma.hbm_to_vmem [thread:$0]  %s4063_s4, 512, %s49_s26, [#allocation6], %s3418_s28, %s3418_s28, %s3419_s29  }
  0x11   :  { %s3420_s15 = smov [#allocation8]   ;;  %s3421_s17 = smov [#allocation2]  }
  0x12   :  { %s75_s16 = sshll.u32 %s3420_s15, 4  ;;  %s32_s18 = sshll.u32 %s3421_s17, 4  ;;  %s76_s16 = int_to_ptr.vmem [resolvable:$true] %s75_s16  ;;  %s33_s18 = int_to_ptr.vmem [resolvable:$true] %s32_s18 }
  0x13   :  { %s3253_s19 = scalar_lea.vmem %s76_s16, 32  ;;  %p3258_p6 = scmp.lt.s32.totalorder %s76_s16, %s76_s16 }
  0x14   :  { %p3254_p5 = scmp.ne.s32.totalorder %s76_s16, %s3253_s19  ;;  %p3259_p7 = scmp.lt.s32.totalorder %s3253_s19, %s3253_s19 }
  0x16   :  { %p3260_p8 = por %p3259_p7, %p3258_p6 }
  0x18   :  { %p3261_p9 = pnand %p3260_p8, %p3254_p5 }
  0x1a   :  { %3264 = shalt.err (!%p3261_p9)
}
  0x1b   :  { %78 = dma.hbm_to_vmem [thread:$0]  %s4066_s7, 32, %s76_s16, [#allocation9]  }
  0x1c   :  { %s3273_s22 = scalar_lea.vmem %s33_s18, 128  ;;  %p3278_p11 = scmp.lt.s32.totalorder %s33_s18, %s33_s18 }
  0x1d   :  { %p3274_p10 = scmp.ne.s32.totalorder %s33_s18, %s3273_s22  ;;  %p3279_p12 = scmp.lt.s32.totalorder %s3273_s22, %s3273_s22 }
  0x1f   :  { %p3280_p13 = por %p3279_p12, %p3278_p11 }
  0x21   :  { %p3281_p0 = pnand %p3280_p13, %p3274_p10 }
  0x23   :  { %3284 = shalt.err (!%p3281_p0)
}
  0x24   :  { %s3422_s4 = smov 64   ;;  %s3423_s23 = smov 4  }
  0x25   :  { %38 = dma.hbm_to_vmem [thread:$0]  %s4060_s1, 128, %s33_s18, [#allocation3], %s3422_s4, %s3422_s4, %s3423_s23  }
  0x26   :  { %s3424_s26 = smov [#allocation7]   ;;  %s3425_s7 = smov [#allocation10]  }
  0x27   :  { %s60_s27 = sshll.u32 %s3424_s26, 4  ;;  %s85_s30 = sshll.u32 %s3425_s7, 4  ;;  %s61_s27 = int_to_ptr.vmem [resolvable:$true] %s60_s27  ;;  %s86_s30 = int_to_ptr.vmem [resolvable:$true] %s85_s30 }
  0x28   :  { %s3293_s14 = scalar_lea.vmem %s61_s27, 512  ;;  %p3298_p2 = scmp.lt.s32.totalorder %s61_s27, %s61_s27 }
  0x29   :  { %p3294_p1 = scmp.ne.s32.totalorder %s61_s27, %s3293_s14  ;;  %p3299_p3 = scmp.lt.s32.totalorder %s3293_s14, %s3293_s14 }
  0x2b   :  { %p3300_p4 = por %p3299_p3, %p3298_p2 }
  0x2d   :  { %p3301_p5 = pnand %p3300_p4, %p3294_p1 }
  0x2f   :  { %3304 = shalt.err (!%p3301_p5)
}
  0x30   :  { %66 = dma.hbm_to_vmem [thread:$0]  %s4064_s5, 512, %s61_s27, [#allocation6], %s3418_s28, %s3418_s28, %s3419_s29  }
  0x31   :  { %s3313_s1 = scalar_lea.vmem %s86_s30, 32  ;;  %p3318_p7 = scmp.lt.s32.totalorder %s86_s30, %s86_s30 }
  0x32   :  { %p3314_p6 = scmp.ne.s32.totalorder %s86_s30, %s3313_s1  ;;  %p3319_p8 = scmp.lt.s32.totalorder %s3313_s1, %s3313_s1 }
  0x34   :  { %p3320_p9 = por %p3319_p8, %p3318_p7 }
  0x36   :  { %p3321_p10 = pnand %p3320_p9, %p3314_p6 }
  0x38   :  { %3324 = shalt.err (!%p3321_p10)
}
  0x39   :  { %88 = dma.hbm_to_vmem [thread:$0]  %s4067_s8, 32, %s86_s30, [#allocation9]  }
  0x3a   :  { %s3426_s19 = smov [#allocation11]  }
  0x3b   :  { %s97_s20 = sshll.u32 %s3426_s19, 4  ;;  %s98_s20 = int_to_ptr.vmem [resolvable:$true] %s97_s20 }
  0x3c   :  { %s3333_s21 = scalar_lea.vmem %s98_s20, 16  ;;  %s3337_s22 = scalar_lea.vmem %s98_s20, 32 }
  0x3d   :  { %p3334_p11 = scmp.ne.s32.totalorder %s98_s20, %s3333_s21  ;;  %p3338_p12 = scmp.lt.s32.totalorder %s98_s20, %s98_s20 }
  0x3e   :  { %p3339_p13 = scmp.lt.s32.totalorder %s3337_s22, %s3333_s21 }
  0x40   :  { %p3340_p0 = por %p3339_p13, %p3338_p12 }
  0x42   :  { %p3341_p1 = pnand %p3340_p0, %p3334_p11 }
  0x44   :  { %3344 = shalt.err (!%p3341_p1)
}
  0x45   :  { %100 = dma.hbm_to_vmem [thread:$0]  %s4069_s10, 16, %s98_s20, [#allocation12]  }
  0x46   :  { %3405 = dma.done.wait [#allocation3], 128  }
  0x47   :  { %3406 = vsyncadd [#allocation3], 4294967168 }
  0x48   :  { %3407 = dma.done.wait [#allocation6], 1024  }
  0x49   :  { %3408 = vsyncadd [#allocation6], 4294966272 }
  0x4a   :  { %3409 = dma.done.wait [#allocation9], 64  }
  0x4b   :  { %3410 = vsyncadd [#allocation9], 4294967232 }
  0x4c   :  { %3411 = dma.done.wait [#allocation12], 16  }
  0x4d   :  { %3412 = vsyncadd [#allocation12], 4294967280  ;;  %v3427_v0 = vmov 0.0   ;;  %vm3428_vm0 = vmmov 0   ;;  %v3539_v1 = vld [vmem:[%s4061_s2 + $0x18] sm:$0xff]  ;;  %v3077_v2 = vld [vmem:[#allocation2] sm:$0xff]  }
  0x4e   :  { %2788 = vmatprep.subr.mxu1 %v3427_v0  ;;  %2782 = vmatprep.subr.bf16.mxu0 %v3427_v0  ;;  %v3545_v3 = vld [vmem:[%s4061_s2 + $0x10] sm:$0xff]  ;;  %v3551_v4 = vld [vmem:[%s4061_s2 + $0x8] sm:$0xff]  ;;  %v138_v5 = vld [vmem:[%s4059_s0] sm:$0xff]  ;;  %vm152_vm1 = vcmask 130048   ;;  %vm196_vm2 = vcmask 261120   ;;  %s3429_s15 = smov 32  }
  0x4f   :  { %2784 = vmatprep.mubr.msk.bf16.mxu0 %vm3428_vm0, %v3427_v0  ;;  %2796 = vmatprep.mubr.msk.f32.mxu1 %vm3428_vm0, %v3427_v0  ;;  %v139_v6 = vpack.c.bf16 %v138_v5, %v138_v5  ;;  %v3560_v7 = vld [vmem:[%s4061_s2] sm:$0xff]  ;;  %v120_v8 = vld [vmem:[#allocation8] sm:$0x3]  ;;  %v3580_v19 = vld [vmem:[#allocation10] sm:$0x3]  ;;  %s3430_s23 = smov 96  }
  0x50   :  { %2789 = vmatpush3.msra.mxu1 %v3539_v1  ;;  %2783 = vmatpush3.bf16.msra.mxu0 %v3077_v2  ;;  %v2609_v9 = vld [vmem:[%s4062_s3] ss:$0 sm:$0xff]  ;;  %v3590_v31 = vld [vmem:[#allocation7 + $0x10] sm:$0xff]  ;;  %v3598_v34 = vld [vmem:[#allocation7 + $0x8] sm:$0xff]  ;;  %v299_v36 = vrot.slane %v120_v8, 1  ;;  %v455_v56 = vrot.slane %v3580_v19, 1 }
  0x51   :  { %2790 = vmatprep.subr.mxu1 %v3427_v0  ;;  %2799 = vmatprep.subr.mxu0 %v3427_v0  ;;  %v3588_v30 = vld [vmem:[#allocation7 + $0x18] sm:$0xff]  ;;  %v3595_v33 = vld [vmem:[#allocation5 + $0x10] sm:$0xff]  ;;  %v3603_v35 = vld [vmem:[#allocation5 + $0x8] sm:$0xff]  ;;  %vm2418_vm10 = vcmask 261127   ;;  %vm2429_vm12 = vcmask 253952  }
  0x52   :  { %2791 = vmatpush3.msra.mxu1 %v3545_v3  ;;  %v3593_v32 = vld [vmem:[#allocation5 + $0x18] sm:$0xff]  ;;  %v3606_v37 = vld [vmem:[#allocation7] sm:$0xff] }
  0x53   :  { %2792 = vmatprep.subr.mxu1 %v3427_v0  ;;  %2785 = vmatmul.mubr.msk.bf16.vlgmr.msra.gmra.mxu0 %vm152_vm1, %v139_v6  ;;  %v3613_v38 = vld [vmem:[#allocation5] sm:$0xff]  ;;  %v3658_v45 = vld [vmem:[%s4065_s6] sm:$0x1] }
  0x54   :  { %2793 = vmatpush3.msra.mxu1 %v3551_v4  ;;  %2807 = vmatprep.mubr.msk.f32.mxu0 %vm3428_vm0, %v3427_v0 }
  0x55   :  { %2794 = vmatprep.subr.mxu1 %v3427_v0  ;;  %2800 = vmatpush3.msra.mxu0 %v3588_v30 }
  0x56   :  { %2795 = vmatpush3.msra.mxu1 %v3560_v7  ;;  %2801 = vmatprep.subr.mxu0 %v3427_v0 }
  0x57   :  { %2797 = vmatmul.mubr.msk.f32.vlgmr.msra.gmra.mxu1 %vm196_vm2, %v120_v8  ;;  %2810 = vmatprep.subr.mxu1 %v3427_v0 }
  0x58   :  { %2818 = vmatprep.mubr.msk.f32.mxu1 %vm3428_vm0, %v3427_v0  ;;  %2811 = vmatpush3.msra.mxu1 %v3593_v32 }
  0x59   :  { %2802 = vmatpush3.msra.mxu0 %v3590_v31  ;;  %2812 = vmatprep.subr.mxu1 %v3427_v0 }
  0x5a   :  { %2803 = vmatprep.subr.mxu0 %v3427_v0  ;;  %2813 = vmatpush3.msra.mxu1 %v3595_v33 }
  0x5b   :  { %2804 = vmatpush3.msra.mxu0 %v3598_v34  ;;  %2814 = vmatprep.subr.mxu1 %v3427_v0 }
  0x5c   :  { %2805 = vmatprep.subr.mxu0 %v3427_v0  ;;  %2815 = vmatpush3.msra.mxu1 %v3603_v35 }
  0x5d   :  { %2806 = vmatpush3.msra.mxu0 %v3606_v37  ;;  %2816 = vmatprep.subr.mxu1 %v3427_v0 }
  0x5e   :  { %2808 = vmatmul.mubr.msk.f32.vlgmr.msra.gmra.mxu0 %vm196_vm2, %v299_v36  ;;  %2821 = vmatprep.subr.mxu0 %v3427_v0 }
  0x5f   :  { %2822 = vmatpush3.msra.mxu0 %v3539_v1  ;;  %2817 = vmatpush3.msra.mxu1 %v3613_v38 }
  0x60   :  { %2823 = vmatprep.subr.mxu0 %v3427_v0  ;;  %2829 = vmatprep.mubr.msk.f32.mxu0 %vm3428_vm0, %v3427_v0 }
  0x61   :  { %2824 = vmatpush3.msra.mxu0 %v3545_v3  ;;  %2832 = vmatprep.subr.mxu1 %v3427_v0 }
  0x62   :  { %2825 = vmatprep.subr.mxu0 %v3427_v0 }
  0x63   :  { %2826 = vmatpush3.msra.mxu0 %v3551_v4 }
  0x64   :  { %2827 = vmatprep.subr.mxu0 %v3427_v0 }
  0x65   :  { %2828 = vmatpush3.msra.mxu0 %v3560_v7 }
  0x66   :  { %2843 = vmatprep.subr.mxu0 %v3427_v0 }
 0x113   :  { %v190_v10 = vpop.f32.mrf.mxu0 }
 0x114   :  { %v3576_v11 = vadd.f32 %v2609_v9, %v190_v10 }
 0x115   :  { %v2786_v12 = vpop.f32.mrf.mxu0 }
 0x117   :  { %v266_v13 = vpop.f32.mrf.mxu1  ;;  %v193_v15 = vpop.f32.mrf.mxu0 }
 0x118   :  { %v270_v14 = vadd.f32 %v266_v13, %v3576_v11 }
 0x119   :  { %v2798_v16 = vpop.f32.mrf.mxu1  ;;  %v2787_v17 = vpop.f32.mrf.mxu0 }
 0x11a   :  { %3080 = vtanh.f32 %v270_v14  ;;  %v2613_v20 = vmul.f32 -1.442695, %v270_v14 }
 0x11c   :  { %3082 = vpow2.f32 %v2613_v20 }
 0x11e   :  { %v368_v42 = vpop.f32.mrf.mxu0 }
 0x120   :  { %v2809_v43 = vpop.f32.mrf.mxu0 }
 0x127   :  { %v3081_v18 = vpop.eup %3080 }
 0x128   :  { %284 = vrot.lane.b32.xlu0 %v3081_v18, %s3422_s4 }
 0x129   :  { %v3083_v21 = vpop.eup %3082 }
 0x12a   :  { %v274_v22 = vadd.f32 1.0, %v3083_v21 }
 0x12c   :  { %279 = vrot.lane.b32.xlu0 %v3580_v19, %s3429_s15  ;;  %3084 = vrcp.f32 %v274_v22 }
 0x139   :  { %v3085_v23 = vpop.eup %3084 }
 0x19a   :  { %v285_v24 = vpop.permute.xlu0 %284 }
 0x19b   :  { %v287_v25 = vmul.f32 %v3085_v23, %v285_v24 }
 0x19d   :  { %289 = vrot.lane.b32.xlu1 %v287_v25, %s3429_s15 }
 0x19e   :  { %v280_v26 = vpop.permute.xlu0 %279 }
 0x19f   :  { %v282_v27 = vmul.f32 %v3085_v23, %v280_v26 }
 0x20f   :  { %v290_v28 = vpop.permute.xlu1 %289 }
 0x210   :  { %v3585_v29 = vadd.f32 %v290_v28, %v282_v27 }
 0x212   :  { %3086 = vtanh.f32 %v3585_v29  ;;  %v558_v12 = vrot.slane %v3585_v29, 7 }
 0x21f   :  { %v3087_v39 = vpop.eup %3086 }
 0x220   :  { %295 = vrot.lane.b32.xlu1 %v3087_v39, %s3422_s4 }
 0x292   :  { %v296_v40 = vpop.permute.xlu1 %295 }
 0x293   :  { %v298_v41 = vmul.f32 %v3085_v23, %v296_v40 }
 0x295   :  { %373 = vrot.lane.b32.xlu0 %v298_v41, %s3429_s15 }
 0x307   :  { %v374_v44 = vpop.permute.xlu0 %373 }
 0x308   :  { %2819 = vmatmul.mubr.msk.f32.vlgmr.msra.gmra.mxu1 %vm196_vm2, %v374_v44  ;;  %2830 = vmatmul.mubr.msk.f32.vlgmr.msra.gmra.mxu0 %vm196_vm2, %v374_v44 }
 0x309   :  { %2833 = vmatpush3.msra.mxu1 %v3588_v30  ;;  %2844 = vmatpush3.msra.mxu0 %v3593_v32 }
 0x30a   :  { %2834 = vmatprep.subr.mxu1 %v3427_v0  ;;  %2845 = vmatprep.subr.mxu0 %v3427_v0 }
 0x30b   :  { %2835 = vmatpush3.msra.mxu1 %v3590_v31  ;;  %2846 = vmatpush3.msra.mxu0 %v3595_v33 }
 0x30c   :  { %2836 = vmatprep.subr.mxu1 %v3427_v0  ;;  %2847 = vmatprep.subr.mxu0 %v3427_v0 }
 0x30d   :  { %2837 = vmatpush3.msra.mxu1 %v3598_v34  ;;  %2840 = vmatprep.mubr.msk.f32.mxu1 %vm3428_vm0, %v3427_v0 }
 0x30e   :  { %2838 = vmatprep.subr.mxu1 %v3427_v0  ;;  %2848 = vmatpush3.msra.mxu0 %v3603_v35 }
 0x30f   :  { %2839 = vmatpush3.msra.mxu1 %v3606_v37  ;;  %2849 = vmatprep.subr.mxu0 %v3427_v0 }
 0x310   :  { %2854 = vmatprep.subr.mxu1 %v3427_v0  ;;  %2850 = vmatpush3.msra.mxu0 %v3613_v38 }
 0x311   :  { %2851 = vmatprep.mubr.msk.f32.mxu0 %vm3428_vm0, %v3427_v0  ;;  %2865 = vmatprep.subr.mxu0 %v3427_v0 }
 0x3c8   :  { %v443_v46 = vpop.f32.mrf.mxu1  ;;  %v542_v47 = vpop.f32.mrf.mxu0 }
 0x3c9   :  { %v444_v48 = vadd.f32 %v443_v46, %v368_v42  ;;  %v547_v49 = vrot.slane %v542_v47, 7 }
 0x3ca   :  { %v2820_v50 = vpop.f32.mrf.mxu1  ;;  %v2831_v51 = vpop.f32.mrf.mxu0 }
 0x3cb   :  { %v447_v52 = vadd.f32 %v444_v48, %v3658_v45  ;;  %v549_v53 = vadd.f32 %v547_v49, %v3576_v11 }
 0x3cd   :  { %3088 = vtanh.f32 %v447_v52  ;;  %v2616_v57 = vmul.f32 -1.442695, %v447_v52  ;;  %v2618_v58 = vmul.f32 -1.442695, %v549_v53 }
 0x3ce   :  { %3090 = vtanh.f32 %v549_v53 }
 0x3cf   :  { %3092 = vpow2.f32 %v2616_v57 }
 0x3d0   :  { %3094 = vpow2.f32 %v2618_v58 }
 0x3da   :  { %v3089_v54 = vpop.eup %3088 }
 0x3db   :  { %v3091_v55 = vpop.eup %3090  ;;  %461 = vrot.lane.b32.xlu1 %v3089_v54, %s3422_s4 }
 0x3dc   :  { %562 = vrot.lane.b32.xlu0 %v3091_v55, %s3422_s4  ;;  %v3093_v59 = vpop.eup %3092 }
 0x3dd   :  { %v3095_v60 = vpop.eup %3094  ;;  %v451_v61 = vadd.f32 1.0, %v3093_v59 }
 0x3de   :  { %v553_v62 = vadd.f32 1.0, %v3095_v60 }
 0x3df   :  { %456 = vrot.lane.b32.xlu1 %v455_v56, %s3429_s15  ;;  %3096 = vrcp.f32 %v451_v61 }
 0x3e0   :  { %3098 = vrcp.f32 %v553_v62 }
 0x3ec   :  { %v3097_v63 = vpop.eup %3096 }
 0x3ed   :  { %v3099_v5 = vpop.eup %3098 }
 0x3ee   :  { %v560_v14 = vmul.f32 %v3099_v5, %v558_v12  ;;  %v2436_v12 = vlaneseq }
 0x44d   :  { %v462_v2 = vpop.permute.xlu1 %461 }
 0x44e   :  { %v563_v6 = vpop.permute.xlu0 %562  ;;  %v464_v8 = vmul.f32 %v3097_v63, %v462_v2 }
 0x44f   :  { %v565_v9 = vmul.f32 %v3099_v5, %v563_v6 }
 0x450   :  { %466 = vrot.lane.b32.xlu0 %v464_v8, %s3429_s15 }
 0x451   :  { %567 = vrot.lane.b32.xlu1 %v565_v9, %s3429_s15  ;;  %v457_v10 = vpop.permute.xlu1 %456 }
 0x452   :  { %v459_v13 = vmul.f32 %v3097_v63, %v457_v10 }
 0x4c2   :  { %v467_v15 = vpop.permute.xlu0 %466 }
 0x4c3   :  { %v568_v16 = vpop.permute.xlu1 %567  ;;  %v3669_v17 = vadd.f32 %v467_v15, %v459_v13  ;;  %v3731_v13 = vshrl.u32 %v2436_v12, 7 }
 0x4c4   :  { %v3671_v18 = vadd.f32 %v568_v16, %v560_v14 }
 0x4c5   :  { %3100 = vtanh.f32 %v3669_v17  ;;  %v3734_v14 = vsub.s32 0, %v3731_v13  ;;  %vm2438_vm3 = vcmp.eq.s32.totalorder %v3731_v13, 0  ;;  %vm2444_vm4 = vcmp.eq.s32.totalorder %v3731_v13, 1 }
 0x4c6   :  { %3102 = vtanh.f32 %v3671_v18  ;;  %v835_v2 = vrot.slane %v3671_v18, 7  ;;  %vm2450_vm5 = vcmp.eq.s32.totalorder %v3731_v13, 2  ;;  %vm2456_vm6 = vcmp.eq.s32.totalorder %v3731_v13, 3 }
 0x4c7   :  { %vm2462_vm7 = vcmp.eq.s32.totalorder %v3731_v13, 4  ;;  %vm2468_vm8 = vcmp.eq.s32.totalorder %v3731_v13, 5  ;;  %vm2474_vm9 = vcmp.eq.s32.totalorder %v3731_v13, 6  ;;  %vm2480_vm11 = vcmp.eq.s32.totalorder %v3731_v13, 7 }
 0x4d2   :  { %v3101_v19 = vpop.eup %3100 }
 0x4d3   :  { %v3103_v20 = vpop.eup %3102  ;;  %472 = vrot.lane.b32.xlu0 %v3101_v19, %s3422_s4 }
 0x4d4   :  { %573 = vrot.lane.b32.xlu1 %v3103_v20, %s3422_s4 }
 0x545   :  { %v473_v21 = vpop.permute.xlu0 %472 }
 0x546   :  { %v574_v22 = vpop.permute.xlu1 %573  ;;  %v3677_v23 = vmul.f32 %v3097_v63, %v473_v21 }
 0x547   :  { %v576_v24 = vmul.f32 %v3099_v5, %v574_v22 }
 0x548   :  { %578 = vrot.lane.b32.xlu0 %v3677_v23, %s3429_s15  ;;  %v2442_v15 = vrot.slane %v3677_v23, %v3734_v14 }
 0x549   :  { %v653_v25 = vrot.slane %v576_v24, 1 }
 0x54a   :  { %v2443_v19 = vsel %vm2438_vm3, %v2442_v15, 0.0 }
 0x54b   :  { %654 = vrot.lane.b32.xlu1 %v653_v25, %s3429_s15 }
 0x5ba   :  { %v579_v26 = vpop.permute.xlu0 %578 }
 0x5bb   :  { %2841 = vmatmul.mubr.msk.f32.vlgmr.msra.gmra.mxu1 %vm196_vm2, %v579_v26 }
 0x5bc   :  { %2855 = vmatpush3.msra.mxu1 %v3539_v1  ;;  %2862 = vmatprep.mubr.msk.f32.mxu1 %vm3428_vm0, %v3427_v0 }
 0x5bd   :  { %v655_v27 = vpop.permute.xlu1 %654  ;;  %2856 = vmatprep.subr.mxu1 %v3427_v0 }
 0x5be   :  { %2852 = vmatmul.mubr.msk.f32.vlgmr.msra.gmra.mxu0 %vm196_vm2, %v655_v27  ;;  %2857 = vmatpush3.msra.mxu1 %v3545_v3 }
 0x5bf   :  { %2858 = vmatprep.subr.mxu1 %v3427_v0  ;;  %2866 = vmatpush3.msra.mxu0 %v3588_v30 }
 0x5c0   :  { %2859 = vmatpush3.msra.mxu1 %v3551_v4  ;;  %2867 = vmatprep.subr.mxu0 %v3427_v0 }
 0x5c1   :  { %2860 = vmatprep.subr.mxu1 %v3427_v0  ;;  %2868 = vmatpush3.msra.mxu0 %v3590_v31 }
 0x5c2   :  { %2861 = vmatpush3.msra.mxu1 %v3560_v7  ;;  %2869 = vmatprep.subr.mxu0 %v3427_v0 }
 0x5c3   :  { %2863 = vmatmul.mubr.msk.f32.vlgmr.msra.gmra.mxu1 %vm196_vm2, %v655_v27  ;;  %2870 = vmatpush3.msra.mxu0 %v3598_v34 }
 0x5c4   :  { %2871 = vmatprep.subr.mxu0 %v3427_v0  ;;  %2873 = vmatprep.mubr.msk.f32.mxu0 %vm3428_vm0, %v3427_v0 }
 0x5c5   :  { %2872 = vmatpush3.msra.mxu0 %v3606_v37  ;;  %2876 = vmatprep.subr.mxu1 %v3427_v0 }
 0x5c6   :  { %2887 = vmatprep.subr.mxu0 %v3427_v0  ;;  %2877 = vmatpush3.msra.mxu1 %v3593_v32 }
 0x5c7   :  { %2878 = vmatprep.subr.mxu1 %v3427_v0  ;;  %2884 = vmatprep.mubr.msk.f32.mxu1 %vm3428_vm0, %v3427_v0 }
 0x5c8   :  { %2879 = vmatpush3.msra.mxu1 %v3595_v33 }
 0x5c9   :  { %2880 = vmatprep.subr.mxu1 %v3427_v0 }
 0x5ca   :  { %2881 = vmatpush3.msra.mxu1 %v3603_v35 }
 0x5cb   :  { %2882 = vmatprep.subr.mxu1 %v3427_v0 }
 0x5cc   :  { %2883 = vmatpush3.msra.mxu1 %v3613_v38 }
 0x5cd   :  { %2898 = vmatprep.subr.mxu1 %v3427_v0 }
 0x67b   :  { %v648_v28 = vpop.f32.mrf.mxu1 }
 0x67d   :  { %v2842_v29 = vpop.f32.mrf.mxu1 }
 0x67e   :  { %v724_v36 = vpop.f32.mrf.mxu0 }
 0x67f   :  { %v725_v39 = vadd.f32 %v724_v36, %v648_v28 }
 0x680   :  { %v2853_v40 = vpop.f32.mrf.mxu0 }
 0x681   :  { %v728_v41 = vadd.f32 %v725_v39, %v3658_v45 }
 0x683   :  { %3104 = vtanh.f32 %v728_v41  ;;  %v819_v42 = vpop.f32.mrf.mxu1  ;;  %v2621_v49 = vmul.f32 -1.442695, %v728_v41 }
 0x684   :  { %v824_v43 = vrot.slane %v819_v42, 6 }
 0x685   :  { %v2864_v44 = vpop.f32.mrf.mxu1 }
 0x686   :  { %v826_v46 = vadd.f32 %v824_v43, %v3576_v11 }
 0x688   :  { %3106 = vtanh.f32 %v826_v46  ;;  %v2623_v50 = vmul.f32 -1.442695, %v826_v46 }
 0x689   :  { %3108 = vpow2.f32 %v2621_v49 }
 0x68a   :  { %3110 = vpow2.f32 %v2623_v50 }
 0x690   :  { %v3105_v47 = vpop.eup %3104 }
 0x691   :  { %738 = vrot.lane.b32.xlu0 %v3105_v47, %s3422_s4 }
 0x695   :  { %v3107_v48 = vpop.eup %3106 }
 0x696   :  { %839 = vrot.lane.b32.xlu1 %v3107_v48, %s3422_s4  ;;  %v3109_v51 = vpop.eup %3108 }
 0x697   :  { %v732_v52 = vadd.f32 1.0, %v3109_v51  ;;  %v3111_v53 = vpop.eup %3110 }
 0x698   :  { %v830_v54 = vadd.f32 1.0, %v3111_v53 }
 0x699   :  { %3112 = vrcp.f32 %v732_v52 }
 0x69a   :  { %3114 = vrcp.f32 %v830_v54 }
 0x6a6   :  { %v3113_v55 = vpop.eup %3112 }
 0x6a7   :  { %v3115_v58 = vpop.eup %3114  ;;  %v736_v61 = vmul.f32 %v3113_v55, %v3669_v17 }
 0x6a8   :  { %v837_v5 = vmul.f32 %v3115_v58, %v835_v2 }
 0x703   :  { %v739_v56 = vpop.permute.xlu0 %738 }
 0x704   :  { %v741_v57 = vmul.f32 %v3113_v55, %v739_v56 }
 0x706   :  { %743 = vrot.lane.b32.xlu0 %v741_v57, %s3429_s15 }
 0x708   :  { %v840_v59 = vpop.permute.xlu1 %839 }
 0x709   :  { %v842_v60 = vmul.f32 %v3115_v58, %v840_v59 }
 0x70b   :  { %844 = vrot.lane.b32.xlu1 %v842_v60, %s3429_s15 }
 0x778   :  { %v744_v62 = vpop.permute.xlu0 %743 }
 0x779   :  { %v3722_v63 = vadd.f32 %v744_v62, %v736_v61 }
 0x77b   :  { %3116 = vtanh.f32 %v3722_v63 }
 0x77d   :  { %v845_v6 = vpop.permute.xlu1 %844 }
 0x77e   :  { %v3726_v8 = vadd.f32 %v845_v6, %v837_v5 }
 0x780   :  { %3118 = vtanh.f32 %v3726_v8  ;;  %v1112_v59 = vrot.slane %v3726_v8, 7 }
 0x788   :  { %v3117_v9 = vpop.eup %3116 }
 0x789   :  { %749 = vrot.lane.b32.xlu0 %v3117_v9, %s3422_s4 }
 0x78d   :  { %v3119_v10 = vpop.eup %3118 }
 0x78e   :  { %850 = vrot.lane.b32.xlu1 %v3119_v10, %s3422_s4 }
 0x7fb   :  { %v750_v16 = vpop.permute.xlu0 %749 }
 0x7fc   :  { %v752_v17 = vmul.f32 %v3113_v55, %v750_v16 }
 0x7fe   :  { %v2448_v18 = vrot.slane %v752_v17, %v3734_v14  ;;  %855 = vrot.lane.b32.xlu0 %v752_v17, %s3429_s15 }
 0x800   :  { %v3742_v20 = vsel %vm2444_vm4, %v2448_v18, %v2443_v19  ;;  %v851_v21 = vpop.permute.xlu1 %850 }
 0x801   :  { %v853_v22 = vmul.f32 %v3115_v58, %v851_v21 }
 0x803   :  { %v930_v24 = vrot.slane %v853_v22, 2 }
 0x805   :  { %931 = vrot.lane.b32.xlu1 %v930_v24, %s3429_s15 }
 0x870   :  { %v856_v25 = vpop.permute.xlu0 %855 }
 0x871   :  { %2874 = vmatmul.mubr.msk.f32.vlgmr.msra.gmra.mxu0 %vm196_vm2, %v856_v25 }
 0x872   :  { %2888 = vmatpush3.msra.mxu0 %v3539_v1  ;;  %2895 = vmatprep.mubr.msk.f32.mxu0 %vm3428_vm0, %v3427_v0 }
 0x873   :  { %2889 = vmatprep.subr.mxu0 %v3427_v0 }
 0x874   :  { %2890 = vmatpush3.msra.mxu0 %v3545_v3 }
 0x875   :  { %2891 = vmatprep.subr.mxu0 %v3427_v0 }
 0x876   :  { %2892 = vmatpush3.msra.mxu0 %v3551_v4 }
 0x877   :  { %2893 = vmatprep.subr.mxu0 %v3427_v0  ;;  %v932_v23 = vpop.permute.xlu1 %931 }
 0x878   :  { %2894 = vmatpush3.msra.mxu0 %v3560_v7  ;;  %2885 = vmatmul.mubr.msk.f32.vlgmr.msra.gmra.mxu1 %vm196_vm2, %v932_v23 }
 0x879   :  { %2896 = vmatmul.mubr.msk.f32.vlgmr.msra.gmra.mxu0 %vm196_vm2, %v932_v23  ;;  %2899 = vmatpush3.msra.mxu1 %v3588_v30 }
 0x87a   :  { %2900 = vmatprep.subr.mxu1 %v3427_v0  ;;  %2909 = vmatprep.subr.mxu0 %v3427_v0 }
 0x87b   :  { %2901 = vmatpush3.msra.mxu1 %v3590_v31  ;;  %2910 = vmatpush3.msra.mxu0 %v3593_v32 }
 0x87c   :  { %2902 = vmatprep.subr.mxu1 %v3427_v0  ;;  %2911 = vmatprep.subr.mxu0 %v3427_v0 }
 0x87d   :  { %2903 = vmatpush3.msra.mxu1 %v3598_v34  ;;  %2912 = vmatpush3.msra.mxu0 %v3595_v33 }
 0x87e   :  { %2904 = vmatprep.subr.mxu1 %v3427_v0  ;;  %2913 = vmatprep.subr.mxu0 %v3427_v0 }
 0x87f   :  { %2905 = vmatpush3.msra.mxu1 %v3606_v37  ;;  %2906 = vmatprep.mubr.msk.f32.mxu1 %vm3428_vm0, %v3427_v0 }
 0x880   :  { %2914 = vmatpush3.msra.mxu0 %v3603_v35  ;;  %2920 = vmatprep.subr.mxu1 %v3427_v0 }
 0x881   :  { %2915 = vmatprep.subr.mxu0 %v3427_v0  ;;  %2917 = vmatprep.mubr.msk.f32.mxu0 %vm3428_vm0, %v3427_v0 }
 0x882   :  { %2916 = vmatpush3.msra.mxu0 %v3613_v38 }
 0x883   :  { %2931 = vmatprep.subr.mxu0 %v3427_v0 }
 0x931   :  { %v925_v26 = vpop.f32.mrf.mxu0 }
 0x933   :  { %v2875_v27 = vpop.f32.mrf.mxu0 }
 0x938   :  { %v1001_v28 = vpop.f32.mrf.mxu1 }
 0x939   :  { %v1002_v29 = vadd.f32 %v1001_v28, %v925_v26  ;;  %v1096_v36 = vpop.f32.mrf.mxu0 }
 0x93a   :  { %v1101_v39 = vrot.slane %v1096_v36, 5  ;;  %v2886_v40 = vpop.f32.mrf.mxu1 }
 0x93b   :  { %v1005_v41 = vadd.f32 %v1002_v29, %v3658_v45  ;;  %v2897_v42 = vpop.f32.mrf.mxu0 }
 0x93c   :  { %v1103_v43 = vadd.f32 %v1101_v39, %v3576_v11 }
 0x93d   :  { %3120 = vtanh.f32 %v1005_v41  ;;  %v2626_v47 = vmul.f32 -1.442695, %v1005_v41 }
 0x93e   :  { %3122 = vtanh.f32 %v1103_v43  ;;  %v2628_v48 = vmul.f32 -1.442695, %v1103_v43 }
 0x93f   :  { %3124 = vpow2.f32 %v2626_v47 }
 0x940   :  { %3126 = vpow2.f32 %v2628_v48 }
 0x94a   :  { %v3121_v44 = vpop.eup %3120 }
 0x94b   :  { %v3123_v46 = vpop.eup %3122  ;;  %1015 = vrot.lane.b32.xlu0 %v3121_v44, %s3422_s4 }
 0x94c   :  { %1116 = vrot.lane.b32.xlu1 %v3123_v46, %s3422_s4  ;;  %v3125_v49 = vpop.eup %3124 }
 0x94d   :  { %v3127_v50 = vpop.eup %3126  ;;  %v1009_v51 = vadd.f32 1.0, %v3125_v49 }
 0x94e   :  { %v1107_v52 = vadd.f32 1.0, %v3127_v50 }
 0x94f   :  { %3128 = vrcp.f32 %v1009_v51 }
 0x950   :  { %3130 = vrcp.f32 %v1107_v52 }
 0x95c   :  { %v3129_v53 = vpop.eup %3128 }
 0x95d   :  { %v3131_v55 = vpop.eup %3130  ;;  %v1013_v60 = vmul.f32 %v3129_v53, %v3722_v63 }
 0x95e   :  { %v1114_v61 = vmul.f32 %v3131_v55, %v1112_v59 }
 0x9bd   :  { %v1016_v54 = vpop.permute.xlu0 %1015 }
 0x9be   :  { %v1117_v56 = vpop.permute.xlu1 %1116  ;;  %v1018_v57 = vmul.f32 %v3129_v53, %v1016_v54 }
 0x9bf   :  { %v1119_v58 = vmul.f32 %v3131_v55, %v1117_v56 }
 0x9c0   :  { %1020 = vrot.lane.b32.xlu0 %v1018_v57, %s3429_s15 }
 0x9c1   :  { %1121 = vrot.lane.b32.xlu1 %v1119_v58, %s3429_s15 }
 0xa32   :  { %v1021_v62 = vpop.permute.xlu0 %1020 }
 0xa33   :  { %v1122_v2 = vpop.permute.xlu1 %1121  ;;  %v3786_v5 = vadd.f32 %v1021_v62, %v1013_v60 }
 0xa34   :  { %v3788_v6 = vadd.f32 %v1122_v2, %v1114_v61 }
 0xa35   :  { %3132 = vtanh.f32 %v3786_v5 }
 0xa36   :  { %3134 = vtanh.f32 %v3788_v6  ;;  %v1389_v57 = vrot.slane %v3788_v6, 7 }
 0xa42   :  { %v3133_v9 = vpop.eup %3132 }
 0xa43   :  { %v3135_v10 = vpop.eup %3134  ;;  %1026 = vrot.lane.b32.xlu0 %v3133_v9, %s3422_s4 }
 0xa44   :  { %1127 = vrot.lane.b32.xlu1 %v3135_v10, %s3422_s4 }
 0xab5   :  { %v1027_v8 = vpop.permute.xlu0 %1026 }
 0xab6   :  { %v1128_v12 = vpop.permute.xlu1 %1127  ;;  %v1029_v63 = vmul.f32 %v3129_v53, %v1027_v8 }
 0xab7   :  { %v1130_v15 = vmul.f32 %v3131_v55, %v1128_v12 }
 0xab8   :  { %v2454_v16 = vrot.slane %v1029_v63, %v3734_v14  ;;  %1132 = vrot.lane.b32.xlu0 %v1029_v63, %s3429_s15 }
 0xab9   :  { %v1207_v17 = vrot.slane %v1130_v15, 3 }
 0xaba   :  { %v3798_v18 = vsel %vm2450_vm5, %v2454_v16, %v3742_v20 }
 0xabb   :  { %1208 = vrot.lane.b32.xlu1 %v1207_v17, %s3429_s15 }
 0xb2a   :  { %v1133_v19 = vpop.permute.xlu0 %1132 }
 0xb2b   :  { %2907 = vmatmul.mubr.msk.f32.vlgmr.msra.gmra.mxu1 %vm196_vm2, %v1133_v19 }
 0xb2c   :  { %2921 = vmatpush3.msra.mxu1 %v3539_v1  ;;  %2928 = vmatprep.mubr.msk.f32.mxu1 %vm3428_vm0, %v3427_v0 }
 0xb2d   :  { %v1209_v21 = vpop.permute.xlu1 %1208  ;;  %2922 = vmatprep.subr.mxu1 %v3427_v0 }
 0xb2e   :  { %2918 = vmatmul.mubr.msk.f32.vlgmr.msra.gmra.mxu0 %vm196_vm2, %v1209_v21  ;;  %2923 = vmatpush3.msra.mxu1 %v3545_v3 }
 0xb2f   :  { %2924 = vmatprep.subr.mxu1 %v3427_v0  ;;  %2932 = vmatpush3.msra.mxu0 %v3588_v30 }
 0xb30   :  { %2925 = vmatpush3.msra.mxu1 %v3551_v4  ;;  %2933 = vmatprep.subr.mxu0 %v3427_v0 }
 0xb31   :  { %2926 = vmatprep.subr.mxu1 %v3427_v0  ;;  %2934 = vmatpush3.msra.mxu0 %v3590_v31 }
 0xb32   :  { %2927 = vmatpush3.msra.mxu1 %v3560_v7  ;;  %2935 = vmatprep.subr.mxu0 %v3427_v0 }
 0xb33   :  { %2929 = vmatmul.mubr.msk.f32.vlgmr.msra.gmra.mxu1 %vm196_vm2, %v1209_v21  ;;  %2936 = vmatpush3.msra.mxu0 %v3598_v34 }
 0xb34   :  { %2937 = vmatprep.subr.mxu0 %v3427_v0  ;;  %2939 = vmatprep.mubr.msk.f32.mxu0 %vm3428_vm0, %v3427_v0 }
 0xb35   :  { %2938 = vmatpush3.msra.mxu0 %v3606_v37  ;;  %2942 = vmatprep.subr.mxu1 %v3427_v0 }
 0xb36   :  { %2953 = vmatprep.subr.mxu0 %v3427_v0  ;;  %2943 = vmatpush3.msra.mxu1 %v3593_v32 }
 0xb37   :  { %2944 = vmatprep.subr.mxu1 %v3427_v0  ;;  %2950 = vmatprep.mubr.msk.f32.mxu1 %vm3428_vm0, %v3427_v0 }
 0xb38   :  { %2945 = vmatpush3.msra.mxu1 %v3595_v33 }
 0xb39   :  { %2946 = vmatprep.subr.mxu1 %v3427_v0 }
 0xb3a   :  { %2947 = vmatpush3.msra.mxu1 %v3603_v35 }
 0xb3b   :  { %2948 = vmatprep.subr.mxu1 %v3427_v0 }
 0xb3c   :  { %2949 = vmatpush3.msra.mxu1 %v3613_v38 }
 0xb3d   :  { %2964 = vmatprep.subr.mxu1 %v3427_v0 }
 0xbeb   :  { %v1202_v20 = vpop.f32.mrf.mxu1 }
 0xbed   :  { %v2908_v22 = vpop.f32.mrf.mxu1 }
 0xbee   :  { %v1278_v24 = vpop.f32.mrf.mxu0 }
 0xbef   :  { %v1279_v25 = vadd.f32 %v1278_v24, %v1202_v20 }
 0xbf0   :  { %v2919_v23 = vpop.f32.mrf.mxu0 }
 0xbf1   :  { %v1282_v26 = vadd.f32 %v1279_v25, %v3658_v45 }
 0xbf3   :  { %3136 = vtanh.f32 %v1282_v26  ;;  %v1373_v27 = vpop.f32.mrf.mxu1  ;;  %v2631_v41 = vmul.f32 -1.442695, %v1282_v26 }
 0xbf4   :  { %v1378_v28 = vrot.slane %v1373_v27, 4 }
 0xbf5   :  { %v2930_v29 = vpop.f32.mrf.mxu1 }
 0xbf6   :  { %v1380_v36 = vadd.f32 %v1378_v28, %v3576_v11 }
 0xbf8   :  { %3138 = vtanh.f32 %v1380_v36  ;;  %v2633_v42 = vmul.f32 -1.442695, %v1380_v36 }
 0xbf9   :  { %3140 = vpow2.f32 %v2631_v41 }
 0xbfa   :  { %3142 = vpow2.f32 %v2633_v42 }
 0xc00   :  { %v3137_v39 = vpop.eup %3136 }
 0xc01   :  { %1292 = vrot.lane.b32.xlu0 %v3137_v39, %s3422_s4 }
 0xc05   :  { %v3139_v40 = vpop.eup %3138 }
 0xc06   :  { %1393 = vrot.lane.b32.xlu1 %v3139_v40, %s3422_s4  ;;  %v3141_v43 = vpop.eup %3140 }
 0xc07   :  { %v1286_v44 = vadd.f32 1.0, %v3141_v43  ;;  %v3143_v46 = vpop.eup %3142 }
 0xc08   :  { %v1384_v47 = vadd.f32 1.0, %v3143_v46 }
 0xc09   :  { %3144 = vrcp.f32 %v1286_v44 }
 0xc0a   :  { %3146 = vrcp.f32 %v1384_v47 }
 0xc16   :  { %v3145_v48 = vpop.eup %3144 }
 0xc17   :  { %v3147_v51 = vpop.eup %3146  ;;  %v1290_v54 = vmul.f32 %v3145_v48, %v3786_v5 }
 0xc18   :  { %v1391_v58 = vmul.f32 %v3147_v51, %v1389_v57 }
 0xc73   :  { %v1293_v49 = vpop.permute.xlu0 %1292 }
 0xc74   :  { %v1295_v50 = vmul.f32 %v3145_v48, %v1293_v49 }
 0xc76   :  { %1297 = vrot.lane.b32.xlu0 %v1295_v50, %s3429_s15 }
 0xc78   :  { %v1394_v52 = vpop.permute.xlu1 %1393 }
 0xc79   :  { %v1396_v53 = vmul.f32 %v3147_v51, %v1394_v52 }
 0xc7b   :  { %1398 = vrot.lane.b32.xlu1 %v1396_v53, %s3429_s15 }
 0xce8   :  { %v1298_v55 = vpop.permute.xlu0 %1297 }
 0xce9   :  { %v3841_v56 = vadd.f32 %v1298_v55, %v1290_v54 }
 0xceb   :  { %3148 = vtanh.f32 %v3841_v56 }
 0xced   :  { %v1399_v59 = vpop.permute.xlu1 %1398 }
 0xcee   :  { %v3845_v60 = vadd.f32 %v1399_v59, %v1391_v58 }
 0xcf0   :  { %3150 = vtanh.f32 %v3845_v60  ;;  %v1666_v44 = vrot.slane %v3845_v60, 7 }
 0xcf8   :  { %v3149_v61 = vpop.eup %3148 }
 0xcf9   :  { %1303 = vrot.lane.b32.xlu0 %v3149_v61, %s3422_s4 }
 0xcfd   :  { %v3151_v62 = vpop.eup %3150 }
 0xcfe   :  { %1404 = vrot.lane.b32.xlu1 %v3151_v62, %s3422_s4  ;;  %v3917_v62 = vld [vmem:[%s4061_s2 + $0x18] sm:$0xff] }
 0xd6b   :  { %v1304_v2 = vpop.permute.xlu0 %1303 }
 0xd6c   :  { %v1306_v5 = vmul.f32 %v3145_v48, %v1304_v2 }
 0xd6e   :  { %v2460_v6 = vrot.slane %v1306_v5, %v3734_v14  ;;  %1409 = vrot.lane.b32.xlu0 %v1306_v5, %s3429_s15  ;;  %v3927_v5 = vld [vmem:[%s4061_s2 + $0x10] sm:$0xff] }
 0xd70   :  { %v3854_v9 = vsel %vm2456_vm6, %v2460_v6, %v3798_v18  ;;  %v1405_v10 = vpop.permute.xlu1 %1404  ;;  %v3935_v6 = vld [vmem:[%s4061_s2 + $0x8] sm:$0xff] }
 0xd71   :  { %v1407_v8 = vmul.f32 %v3147_v51, %v1405_v10 }
 0xd73   :  { %v1484_v12 = vrot.slane %v1407_v8, 4 }
 0xd75   :  { %1485 = vrot.lane.b32.xlu1 %v1484_v12, %s3429_s15 }
 0xde0   :  { %v1410_v63 = vpop.permute.xlu0 %1409 }
 0xde1   :  { %2940 = vmatmul.mubr.msk.f32.vlgmr.msra.gmra.mxu0 %vm196_vm2, %v1410_v63 }
 0xde2   :  { %2954 = vmatpush3.msra.mxu0 %v3539_v1  ;;  %2961 = vmatprep.mubr.msk.f32.mxu0 %vm3428_vm0, %v3427_v0 }
 0xde3   :  { %2955 = vmatprep.subr.mxu0 %v3427_v0 }
 0xde4   :  { %2956 = vmatpush3.msra.mxu0 %v3545_v3 }
 0xde5   :  { %2957 = vmatprep.subr.mxu0 %v3427_v0 }
 0xde6   :  { %2958 = vmatpush3.msra.mxu0 %v3551_v4 }
 0xde7   :  { %2959 = vmatprep.subr.mxu0 %v3427_v0  ;;  %v1486_v15 = vpop.permute.xlu1 %1485 }
 0xde8   :  { %2960 = vmatpush3.msra.mxu0 %v3560_v7  ;;  %2951 = vmatmul.mubr.msk.f32.vlgmr.msra.gmra.mxu1 %vm196_vm2, %v1486_v15 }
 0xde9   :  { %2962 = vmatmul.mubr.msk.f32.vlgmr.msra.gmra.mxu0 %vm196_vm2, %v1486_v15  ;;  %2965 = vmatpush3.msra.mxu1 %v3588_v30 }
 0xdea   :  { %2966 = vmatprep.subr.mxu1 %v3427_v0  ;;  %2975 = vmatprep.subr.mxu0 %v3427_v0 }
 0xdeb   :  { %2967 = vmatpush3.msra.mxu1 %v3590_v31  ;;  %2976 = vmatpush3.msra.mxu0 %v3593_v32 }
 0xdec   :  { %2968 = vmatprep.subr.mxu1 %v3427_v0  ;;  %2977 = vmatprep.subr.mxu0 %v3427_v0 }
 0xded   :  { %2969 = vmatpush3.msra.mxu1 %v3598_v34  ;;  %2978 = vmatpush3.msra.mxu0 %v3595_v33 }
 0xdee   :  { %2970 = vmatprep.subr.mxu1 %v3427_v0  ;;  %2979 = vmatprep.subr.mxu0 %v3427_v0 }
 0xdef   :  { %2971 = vmatpush3.msra.mxu1 %v3606_v37  ;;  %2972 = vmatprep.mubr.msk.f32.mxu1 %vm3428_vm0, %v3427_v0 }
 0xdf0   :  { %2980 = vmatpush3.msra.mxu0 %v3603_v35  ;;  %2986 = vmatprep.subr.mxu1 %v3427_v0 }
 0xdf1   :  { %2981 = vmatprep.subr.mxu0 %v3427_v0  ;;  %2983 = vmatprep.mubr.msk.f32.mxu0 %vm3428_vm0, %v3427_v0 }
 0xdf2   :  { %2982 = vmatpush3.msra.mxu0 %v3613_v38 }
 0xdf3   :  { %2997 = vmatprep.subr.mxu0 %v3427_v0 }
 0xea1   :  { %v1479_v1 = vpop.f32.mrf.mxu0 }
 0xea3   :  { %v2941_v3 = vpop.f32.mrf.mxu0 }
 0xea8   :  { %v1555_v4 = vpop.f32.mrf.mxu1 }
 0xea9   :  { %v1556_v7 = vadd.f32 %v1555_v4, %v1479_v1  ;;  %v1650_v16 = vpop.f32.mrf.mxu0 }
 0xeaa   :  { %v1655_v17 = vrot.slane %v1650_v16, 3  ;;  %v2952_v18 = vpop.f32.mrf.mxu1 }
 0xeab   :  { %v1559_v19 = vadd.f32 %v1556_v7, %v3658_v45  ;;  %v2963_v21 = vpop.f32.mrf.mxu0 }
 0xeac   :  { %v1657_v20 = vadd.f32 %v1655_v17, %v3576_v11 }
 0xead   :  { %3152 = vtanh.f32 %v1559_v19  ;;  %v2636_v25 = vmul.f32 -1.442695, %v1559_v19 }
 0xeae   :  { %3154 = vtanh.f32 %v1657_v20  ;;  %v2638_v23 = vmul.f32 -1.442695, %v1657_v20 }
 0xeaf   :  { %3156 = vpow2.f32 %v2636_v25 }
 0xeb0   :  { %3158 = vpow2.f32 %v2638_v23 }
 0xeba   :  { %v3153_v22 = vpop.eup %3152 }
 0xebb   :  { %v3155_v24 = vpop.eup %3154  ;;  %1569 = vrot.lane.b32.xlu0 %v3153_v22, %s3422_s4 }
 0xebc   :  { %1670 = vrot.lane.b32.xlu1 %v3155_v24, %s3422_s4  ;;  %v3157_v26 = vpop.eup %3156 }
 0xebd   :  { %v3159_v27 = vpop.eup %3158  ;;  %v1563_v28 = vadd.f32 1.0, %v3157_v26 }
 0xebe   :  { %v1661_v29 = vadd.f32 1.0, %v3159_v27 }
 0xebf   :  { %3160 = vrcp.f32 %v1563_v28 }
 0xec0   :  { %3162 = vrcp.f32 %v1661_v29 }
 0xecc   :  { %v3161_v36 = vpop.eup %3160 }
 0xecd   :  { %v3163_v40 = vpop.eup %3162  ;;  %v1567_v46 = vmul.f32 %v3161_v36, %v3841_v56 }
 0xece   :  { %v1668_v47 = vmul.f32 %v3163_v40, %v1666_v44 }
 0xf2d   :  { %v1570_v39 = vpop.permute.xlu0 %1569 }
 0xf2e   :  { %v1671_v41 = vpop.permute.xlu1 %1670  ;;  %v1572_v42 = vmul.f32 %v3161_v36, %v1570_v39 }
 0xf2f   :  { %v1673_v43 = vmul.f32 %v3163_v40, %v1671_v41 }
 0xf30   :  { %1574 = vrot.lane.b32.xlu0 %v1572_v42, %s3429_s15 }
 0xf31   :  { %1675 = vrot.lane.b32.xlu1 %v1673_v43, %s3429_s15 }
 0xfa2   :  { %v1575_v48 = vpop.permute.xlu0 %1574 }
 0xfa3   :  { %v1676_v49 = vpop.permute.xlu1 %1675  ;;  %v3898_v50 = vadd.f32 %v1575_v48, %v1567_v46 }
 0xfa4   :  { %v3900_v51 = vadd.f32 %v1676_v49, %v1668_v47  ;;  %v3216_v49 = vld [vmem:[#allocation7 + $0x18] sm:$0xff] }
 0xfa5   :  { %3164 = vtanh.f32 %v3898_v50 }
 0xfa6   :  { %3166 = vtanh.f32 %v3900_v51  ;;  %v1943_v23 = vrot.slane %v3900_v51, 7  ;;  %v3218_v51 = vld [vmem:[#allocation5 + $0x18] sm:$0xff] }
 0xfb2   :  { %v3165_v52 = vpop.eup %3164 }
 0xfb3   :  { %v3167_v53 = vpop.eup %3166  ;;  %1580 = vrot.lane.b32.xlu0 %v3165_v52, %s3422_s4  ;;  %v3219_v52 = vld [vmem:[#allocation7 + $0x8] sm:$0xff] }
 0xfb4   :  { %1681 = vrot.lane.b32.xlu1 %v3167_v53, %s3422_s4  ;;  %v3220_v53 = vld [vmem:[#allocation5 + $0x10] sm:$0xff] }
0x1025   :  { %v1581_v54 = vpop.permute.xlu0 %1580 }
0x1026   :  { %v1682_v55 = vpop.permute.xlu1 %1681  ;;  %v1583_v56 = vmul.f32 %v3161_v36, %v1581_v54  ;;  %v3221_v54 = vld [vmem:[#allocation7] sm:$0xff] }
0x1027   :  { %v1684_v57 = vmul.f32 %v3163_v40, %v1682_v55  ;;  %v3222_v55 = vld [vmem:[#allocation5 + $0x8] sm:$0xff] }
0x1028   :  { %v2466_v58 = vrot.slane %v1583_v56, %v3734_v14  ;;  %1686 = vrot.lane.b32.xlu0 %v1583_v56, %s3429_s15  ;;  %v3223_v56 = vld [vmem:[#allocation5] sm:$0xff] }
0x1029   :  { %v1761_v59 = vrot.slane %v1684_v57, 5 }
0x102a   :  { %v3910_v60 = vsel %vm2462_vm7, %v2466_v58, %v3854_v9  ;;  %v3944_v9 = vld [vmem:[%s4061_s2] sm:$0xff] }
0x102b   :  { %1762 = vrot.lane.b32.xlu1 %v1761_v59, %s3429_s15 }
0x109a   :  { %v1687_v61 = vpop.permute.xlu0 %1686 }
0x109b   :  { %2973 = vmatmul.mubr.msk.f32.vlgmr.msra.gmra.mxu1 %vm196_vm2, %v1687_v61 }
0x109c   :  { %2987 = vmatpush3.msra.mxu1 %v3917_v62  ;;  %2994 = vmatprep.mubr.msk.f32.mxu1 %vm3428_vm0, %v3427_v0 }
0x109d   :  { %v1763_v2 = vpop.permute.xlu1 %1762  ;;  %2988 = vmatprep.subr.mxu1 %v3427_v0 }
0x109e   :  { %2984 = vmatmul.mubr.msk.f32.vlgmr.msra.gmra.mxu0 %vm196_vm2, %v1763_v2  ;;  %2989 = vmatpush3.msra.mxu1 %v3927_v5 }
0x109f   :  { %2990 = vmatprep.subr.mxu1 %v3427_v0  ;;  %2998 = vmatpush3.msra.mxu0 %v3588_v30 }
0x10a0   :  { %2991 = vmatpush3.msra.mxu1 %v3935_v6  ;;  %2999 = vmatprep.subr.mxu0 %v3427_v0 }
0x10a1   :  { %2992 = vmatprep.subr.mxu1 %v3427_v0  ;;  %3000 = vmatpush3.msra.mxu0 %v3590_v31 }
0x10a2   :  { %2993 = vmatpush3.msra.mxu1 %v3944_v9  ;;  %3001 = vmatprep.subr.mxu0 %v3427_v0 }
0x10a3   :  { %2995 = vmatmul.mubr.msk.f32.vlgmr.msra.gmra.mxu1 %vm196_vm2, %v1763_v2  ;;  %3002 = vmatpush3.msra.mxu0 %v3598_v34 }
0x10a4   :  { %3003 = vmatprep.subr.mxu0 %v3427_v0  ;;  %3005 = vmatprep.mubr.msk.f32.mxu0 %vm3428_vm0, %v3427_v0 }
0x10a5   :  { %3004 = vmatpush3.msra.mxu0 %v3606_v37  ;;  %3008 = vmatprep.subr.mxu1 %v3427_v0 }
0x10a6   :  { %3019 = vmatprep.subr.mxu0 %v3427_v0  ;;  %3009 = vmatpush3.msra.mxu1 %v3593_v32 }
0x10a7   :  { %3010 = vmatprep.subr.mxu1 %v3427_v0  ;;  %3016 = vmatprep.mubr.msk.f32.mxu1 %vm3428_vm0, %v3427_v0 }
0x10a8   :  { %3011 = vmatpush3.msra.mxu1 %v3595_v33 }
0x10a9   :  { %3012 = vmatprep.subr.mxu1 %v3427_v0 }
0x10aa   :  { %3013 = vmatpush3.msra.mxu1 %v3603_v35 }
0x10ab   :  { %3014 = vmatprep.subr.mxu1 %v3427_v0 }
0x10ac   :  { %3015 = vmatpush3.msra.mxu1 %v3613_v38 }
0x10ad   :  { %3030 = vmatprep.subr.mxu1 %v3427_v0 }
0x115b   :  { %v1756_v30 = vpop.f32.mrf.mxu1 }
0x115d   :  { %v2974_v31 = vpop.f32.mrf.mxu1 }
0x115e   :  { %v1832_v32 = vpop.f32.mrf.mxu0 }
0x115f   :  { %v1833_v34 = vadd.f32 %v1832_v32, %v1756_v30 }
0x1160   :  { %v2985_v37 = vpop.f32.mrf.mxu0 }
0x1161   :  { %v1836_v10 = vadd.f32 %v1833_v34, %v3658_v45 }
0x1163   :  { %3168 = vtanh.f32 %v1836_v10  ;;  %v1927_v8 = vpop.f32.mrf.mxu1  ;;  %v2641_v15 = vmul.f32 -1.442695, %v1836_v10 }
0x1164   :  { %v1932_v33 = vrot.slane %v1927_v8, 2 }
0x1165   :  { %v2996_v12 = vpop.f32.mrf.mxu1 }
0x1166   :  { %v1934_v63 = vadd.f32 %v1932_v33, %v3576_v11 }
0x1168   :  { %3170 = vtanh.f32 %v1934_v63  ;;  %v2643_v1 = vmul.f32 -1.442695, %v1934_v63 }
0x1169   :  { %3172 = vpow2.f32 %v2641_v15 }
0x116a   :  { %3174 = vpow2.f32 %v2643_v1 }
0x1170   :  { %v3169_v35 = vpop.eup %3168 }
0x1171   :  { %1846 = vrot.lane.b32.xlu0 %v3169_v35, %s3422_s4 }
0x1175   :  { %v3171_v38 = vpop.eup %3170 }
0x1176   :  { %1947 = vrot.lane.b32.xlu1 %v3171_v38, %s3422_s4  ;;  %v3173_v3 = vpop.eup %3172 }
0x1177   :  { %v1840_v4 = vadd.f32 1.0, %v3173_v3  ;;  %v3175_v45 = vpop.eup %3174 }
0x1178   :  { %v1938_v7 = vadd.f32 1.0, %v3175_v45 }
0x1179   :  { %3176 = vrcp.f32 %v1840_v4 }
0x117a   :  { %3178 = vrcp.f32 %v1938_v7 }
0x1186   :  { %v3177_v16 = vpop.eup %3176 }
0x1187   :  { %v3179_v19 = vpop.eup %3178  ;;  %v1844_v22 = vmul.f32 %v3177_v16, %v3898_v50  ;;  %v3217_v50 = vld [vmem:[#allocation7 + $0x10] sm:$0xff] }
0x1188   :  { %v1945_v26 = vmul.f32 %v3179_v19, %v1943_v23 }
0x11e3   :  { %v1847_v17 = vpop.permute.xlu0 %1846 }
0x11e4   :  { %v1849_v18 = vmul.f32 %v3177_v16, %v1847_v17 }
0x11e6   :  { %1851 = vrot.lane.b32.xlu0 %v1849_v18, %s3429_s15 }
0x11e8   :  { %v1948_v21 = vpop.permute.xlu1 %1947 }
0x11e9   :  { %v1950_v20 = vmul.f32 %v3179_v19, %v1948_v21 }
0x11eb   :  { %1952 = vrot.lane.b32.xlu1 %v1950_v20, %s3429_s15 }
0x1258   :  { %v1852_v24 = vpop.permute.xlu0 %1851 }
0x1259   :  { %v3973_v25 = vadd.f32 %v1852_v24, %v1844_v22 }
0x125b   :  { %3180 = vtanh.f32 %v3973_v25 }
0x125d   :  { %v1953_v27 = vpop.permute.xlu1 %1952 }
0x125e   :  { %v3977_v28 = vadd.f32 %v1953_v27, %v1945_v26 }
0x1260   :  { %3182 = vtanh.f32 %v3977_v28  ;;  %v2220_v3 = vrot.slane %v3977_v28, 7 }
0x1268   :  { %v3181_v29 = vpop.eup %3180 }
0x1269   :  { %1857 = vrot.lane.b32.xlu0 %v3181_v29, %s3422_s4 }
0x126d   :  { %v3183_v36 = vpop.eup %3182 }
0x126e   :  { %1958 = vrot.lane.b32.xlu1 %v3183_v36, %s3422_s4 }
0x12db   :  { %v1858_v39 = vpop.permute.xlu0 %1857 }
0x12dc   :  { %v1860_v40 = vmul.f32 %v3177_v16, %v1858_v39 }
0x12de   :  { %v2472_v41 = vrot.slane %v1860_v40, %v3734_v14  ;;  %1963 = vrot.lane.b32.xlu0 %v1860_v40, %s3429_s15 }
0x12e0   :  { %v3986_v42 = vsel %vm2468_vm8, %v2472_v41, %v3910_v60  ;;  %v1959_v43 = vpop.permute.xlu1 %1958 }
0x12e1   :  { %v1961_v44 = vmul.f32 %v3179_v19, %v1959_v43 }
0x12e3   :  { %v2038_v46 = vrot.slane %v1961_v44, 6 }
0x12e5   :  { %2039 = vrot.lane.b32.xlu1 %v2038_v46, %s3429_s15 }
0x1350   :  { %v1964_v47 = vpop.permute.xlu0 %1963 }
0x1351   :  { %3006 = vmatmul.mubr.msk.f32.vlgmr.msra.gmra.mxu0 %vm196_vm2, %v1964_v47 }
0x1352   :  { %3020 = vmatpush3.msra.mxu0 %v3917_v62  ;;  %3027 = vmatprep.mubr.msk.f32.mxu0 %vm3428_vm0, %v3427_v0 }
0x1353   :  { %3021 = vmatprep.subr.mxu0 %v3427_v0 }
0x1354   :  { %3022 = vmatpush3.msra.mxu0 %v3927_v5  ;;  %v3224_v5 = vld [vmem:[%s4065_s6] sm:$0x1] }
0x1355   :  { %3023 = vmatprep.subr.mxu0 %v3427_v0 }
0x1356   :  { %3024 = vmatpush3.msra.mxu0 %v3935_v6 }
0x1357   :  { %3025 = vmatprep.subr.mxu0 %v3427_v0  ;;  %v2040_v48 = vpop.permute.xlu1 %2039 }
0x1358   :  { %3026 = vmatpush3.msra.mxu0 %v3944_v9  ;;  %3017 = vmatmul.mubr.msk.f32.vlgmr.msra.gmra.mxu1 %vm196_vm2, %v2040_v48 }
0x1359   :  { %3028 = vmatmul.mubr.msk.f32.vlgmr.msra.gmra.mxu0 %vm196_vm2, %v2040_v48  ;;  %3031 = vmatpush3.msra.mxu1 %v3216_v49 }
0x135a   :  { %3032 = vmatprep.subr.mxu1 %v3427_v0  ;;  %3041 = vmatprep.subr.mxu0 %v3427_v0 }
0x135b   :  { %3033 = vmatpush3.msra.mxu1 %v3217_v50  ;;  %3042 = vmatpush3.msra.mxu0 %v3218_v51 }
0x135c   :  { %3034 = vmatprep.subr.mxu1 %v3427_v0  ;;  %3043 = vmatprep.subr.mxu0 %v3427_v0 }
0x135d   :  { %3035 = vmatpush3.msra.mxu1 %v3219_v52  ;;  %3044 = vmatpush3.msra.mxu0 %v3220_v53 }
0x135e   :  { %3036 = vmatprep.subr.mxu1 %v3427_v0  ;;  %3045 = vmatprep.subr.mxu0 %v3427_v0 }
0x135f   :  { %3037 = vmatpush3.msra.mxu1 %v3221_v54  ;;  %3038 = vmatprep.mubr.msk.f32.mxu1 %vm3428_vm0, %v3427_v0 }
0x1360   :  { %3046 = vmatpush3.msra.mxu0 %v3222_v55  ;;  %3049 = vmatprep.mubr.msk.f32.mxu0 %vm3428_vm0, %v3427_v0 }
0x1361   :  { %3047 = vmatprep.subr.mxu0 %v3427_v0  ;;  %3052 = vmatprep.subr.bf16.mxu1 %v3427_v0 }
0x1362   :  { %3048 = vmatpush3.msra.mxu0 %v3223_v56  ;;  %v3078_v56 = vld [vmem:[%s4068_s9 + $0x8] sm:$0xff]  }
0x1411   :  { %v2033_v57 = vpop.f32.mrf.mxu0 }
0x1413   :  { %v3007_v58 = vpop.f32.mrf.mxu0 }
0x1418   :  { %v2109_v59 = vpop.f32.mrf.mxu1 }
0x1419   :  { %v2110_v60 = vadd.f32 %v2109_v59, %v2033_v57  ;;  %v2204_v61 = vpop.f32.mrf.mxu0  ;;  %v3079_v57 = vld [vmem:[%s4068_s9] sm:$0xff]   ;;  %s3431_s9 = smov [#allocation14]  }
0x141a   :  { %v2209_v62 = vrot.slane %v2204_v61, 1  ;;  %v3018_v2 = vpop.f32.mrf.mxu1 }
0x141b   :  { %v2113_v6 = vadd.f32 %v3224_v5, %v2110_v60  ;;  %v3029_v9 = vpop.f32.mrf.mxu0 }
0x141c   :  { %v2211_v30 = vadd.f32 %v2209_v62, %v3576_v11 }
0x141d   :  { %3184 = vtanh.f32 %v2113_v6  ;;  %v2646_v34 = vmul.f32 -1.442695, %v2113_v6 }
0x141e   :  { %3186 = vtanh.f32 %v2211_v30  ;;  %v2648_v37 = vmul.f32 -1.442695, %v2211_v30 }
0x141f   :  { %3188 = vpow2.f32 %v2646_v34 }
0x1420   :  { %3190 = vpow2.f32 %v2648_v37 }
0x142a   :  { %v3185_v31 = vpop.eup %3184 }
0x142b   :  { %v3187_v32 = vpop.eup %3186  ;;  %2123 = vrot.lane.b32.xlu1 %v3185_v31, %s3422_s4 }
0x142c   :  { %2224 = vrot.lane.b32.xlu0 %v3187_v32, %s3422_s4  ;;  %v3189_v10 = vpop.eup %3188 }
0x142d   :  { %v3191_v8 = vpop.eup %3190  ;;  %v2117_v33 = vadd.f32 1.0, %v3189_v10 }
0x142e   :  { %v2215_v12 = vadd.f32 1.0, %v3191_v8 }
0x142f   :  { %3192 = vrcp.f32 %v2117_v33 }
0x1430   :  { %3194 = vrcp.f32 %v2215_v12 }
0x143c   :  { %v3193_v63 = vpop.eup %3192 }
0x143d   :  { %v3195_v35 = vpop.eup %3194  ;;  %v2121_v4 = vmul.f32 %v3193_v63, %v3973_v25 }
0x143e   :  { %v2222_v45 = vmul.f32 %v3195_v35, %v2220_v3 }
0x149d   :  { %v2124_v11 = vpop.permute.xlu1 %2123 }
0x149e   :  { %v2225_v38 = vpop.permute.xlu0 %2224  ;;  %v2126_v15 = vmul.f32 %v3193_v63, %v2124_v11 }
0x149f   :  { %v2227_v1 = vmul.f32 %v3195_v35, %v2225_v38 }
0x14a0   :  { %2128 = vrot.lane.b32.xlu1 %v2126_v15, %s3429_s15 }
0x14a1   :  { %2229 = vrot.lane.b32.xlu0 %v2227_v1, %s3429_s15 }
0x1512   :  { %v2129_v7 = vpop.permute.xlu1 %2128 }
0x1513   :  { %v2230_v16 = vpop.permute.xlu0 %2229  ;;  %v2131_v17 = vadd.f32 %v2129_v7, %v2121_v4 }
0x1514   :  { %v2232_v18 = vadd.f32 %v2230_v16, %v2222_v45 }
0x1515   :  { %3196 = vtanh.f32 %v2131_v17 }
0x1516   :  { %3198 = vtanh.f32 %v2232_v18 }
0x1522   :  { %v3197_v19 = vpop.eup %3196 }
0x1523   :  { %v3199_v21 = vpop.eup %3198  ;;  %2134 = vrot.lane.b32.xlu1 %v3197_v19, %s3422_s4 }
0x1524   :  { %2235 = vrot.lane.b32.xlu0 %v3199_v21, %s3422_s4 }
0x1595   :  { %v2135_v20 = vpop.permute.xlu1 %2134 }
0x1596   :  { %v2236_v22 = vpop.permute.xlu0 %2235  ;;  %v2137_v24 = vmul.f32 %v3193_v63, %v2135_v20 }
0x1597   :  { %v2238_v23 = vmul.f32 %v3195_v35, %v2236_v22 }
0x1598   :  { %v2478_v25 = vrot.slane %v2137_v24, %v3734_v14  ;;  %2240 = vrot.lane.b32.xlu0 %v2137_v24, %s3429_s15 }
0x1599   :  { %v2315_v26 = vrot.slane %v2238_v23, 7 }
0x159a   :  { %v2479_v27 = vsel %vm2474_vm9, %v2478_v25, %v3986_v42 }
0x159b   :  { %2316 = vrot.lane.b32.xlu1 %v2315_v26, %s3429_s15 }
0x160a   :  { %v2241_v28 = vpop.permute.xlu0 %2240 }
0x160b   :  { %3039 = vmatmul.mubr.msk.f32.vlgmr.msra.gmra.mxu1 %vm196_vm2, %v2241_v28 }
0x160c   :  { %3056 = vmatprep.mubr.msk.bf16.mxu1 %vm3428_vm0, %v3427_v0  ;;  %3053 = vmatpush3.bf16.msra.mxu1 %v3078_v56 }
0x160d   :  { %v2317_v29 = vpop.permute.xlu1 %2316  ;;  %3054 = vmatprep.subr.bf16.mxu1 %v3427_v0 }
0x160e   :  { %3050 = vmatmul.mubr.msk.f32.vlgmr.msra.gmra.mxu0 %vm196_vm2, %v2317_v29 }
0x1610   :  { %3055 = vmatpush3.bf16.msra.mxu1 %v3079_v57 }
0x16cb   :  { %v2310_v36 = vpop.f32.mrf.mxu1 }
0x16cd   :  { %v3040_v39 = vpop.f32.mrf.mxu1 }
0x16ce   :  { %v2386_v40 = vpop.f32.mrf.mxu0 }
0x16cf   :  { %v2387_v41 = vadd.f32 %v2386_v40, %v2310_v36 }
0x16d0   :  { %v3051_v43 = vpop.f32.mrf.mxu0 }
0x16d1   :  { %v2390_v44 = vadd.f32 %v3224_v5, %v2387_v41 }
0x16d3   :  { %3200 = vtanh.f32 %v2390_v44  ;;  %v2651_v42 = vmul.f32 -1.442695, %v2390_v44 }
0x16d5   :  { %3202 = vpow2.f32 %v2651_v42 }
0x16e0   :  { %v3201_v46 = vpop.eup %3200 }
0x16e1   :  { %2400 = vrot.lane.b32.xlu0 %v3201_v46, %s3422_s4 }
0x16e2   :  { %v3203_v47 = vpop.eup %3202 }
0x16e3   :  { %v2394_v48 = vadd.f32 1.0, %v3203_v47 }
0x16e5   :  { %3204 = vrcp.f32 %v2394_v48 }
0x16f2   :  { %v3205_v49 = vpop.eup %3204 }
0x16f3   :  { %v2398_v52 = vmul.f32 %v3205_v49, %v2131_v17 }
0x1753   :  { %v2401_v50 = vpop.permute.xlu0 %2400 }
0x1754   :  { %v2403_v51 = vmul.f32 %v3205_v49, %v2401_v50 }
0x1756   :  { %2405 = vrot.lane.b32.xlu1 %v2403_v51, %s3429_s15 }
0x17c8   :  { %v2406_v53 = vpop.permute.xlu1 %2405 }
0x17c9   :  { %v2408_v54 = vadd.f32 %v2406_v53, %v2398_v52 }
0x17cb   :  { %3206 = vtanh.f32 %v2408_v54 }
0x17d8   :  { %v3207_v55 = vpop.eup %3206 }
0x17d9   :  { %2411 = vrot.lane.b32.xlu0 %v3207_v55, %s3422_s4  ;;  %s2580_s4 = sshll.u32 %s3431_s9, 4  ;;  %s2581_s4 = int_to_ptr.vmem [resolvable:$true] %s2580_s4 }
0x17da   :  { %s3345_s24 = scalar_lea.vmem %s2581_s4, 32  ;;  %p3350_p3 = scmp.lt.s32.totalorder %s2581_s4, %s2581_s4 }
0x17db   :  { %p3346_p2 = scmp.ne.s32.totalorder %s2581_s4, %s3345_s24  ;;  %p3351_p4 = scmp.lt.s32.totalorder %s3345_s24, %s3345_s24 }
0x17dd   :  { %2415 = vrot.lane.b32.xlu0 %v2238_v23, %s3429_s15  ;;  %p3352_p5 = por %p3351_p4, %p3350_p3 }
0x17df   :  { %p3353_p6 = pnand %p3352_p5, %p3346_p2 }
0x17e1   :  { %2421 = vrot.lane.b32.xlu0 %v2232_v18, %s3430_s23 }
0x184b   :  { %v2412_v58 = vpop.permute.xlu0 %2411 }
0x184c   :  { %v2414_v59 = vmul.f32 %v3205_v49, %v2412_v58 }
0x184e   :  { %v2484_v60 = vrot.slane %v2414_v59, %v3734_v14 }
0x184f   :  { %v2416_v61 = vpop.permute.xlu0 %2415 }
0x1850   :  { %2419 = vst.msk [vmem:[#allocation14 - $0x7] sm:$0x80] %vm2418_vm10, %v2416_v61  ;;  %v2485_v62 = vsel %vm2480_vm11, %v2484_v60, %v2479_v27 }
0x1851   :  { %v2486_v2 = vpack.c.bf16 %v2485_v62, %v2485_v62 }
0x1853   :  { %2499 = vrot.lane.b32.xlu1 %v2486_v2, %s3429_s15  ;;  %v2422_v5 = vpop.permute.xlu0 %2421 }
0x1854   :  { %2424 = vst.msk [vmem:[#allocation16 - $0x7] sm:$0x80] %vm2418_vm10, %v2422_v5 }
0x1857   :  { %2426 = vrot.lane.b32.xlu1 %v2414_v59, %s3429_s15 }
0x185b   :  { %2432 = vrot.lane.b32.xlu1 %v2408_v54, %s3430_s23 }
0x18c5   :  { %v2500_v0 = vpop.permute.xlu1 %2499 }
0x18c6   :  { %3057 = vmatmul.mubr.msk.bf16.vlgmr.msra.gmra.mxu1 %vm196_vm2, %v2500_v0 }
0x18c9   :  { %v2427_v6 = vpop.permute.xlu1 %2426 }
0x18ca   :  { %2430 = vst.msk [vmem:[#allocation14 + $0x1] sm:$0x1] %vm2429_vm12, %v2427_v6 }
0x18cd   :  { %v2433_v13 = vpop.permute.xlu1 %2432 }
0x18ce   :  { %2435 = vst.msk [vmem:[#allocation16 + $0x1] sm:$0x1] %vm2429_vm12, %v2433_v13 }
0x18cf   :  { %3356 = shalt.err (!%p3353_p6)
}
0x18d0   :  { %2583 = dma.vmem_to_hbm [thread:$0]  %s2581_s4, 32, %s4071_s12, [#allocation15]  }
0x18d1   :  { %s3432_s27 = smov [#allocation16]  }
0x18d2   :  { %s2590_s7 = sshll.u32 %s3432_s27, 4  ;;  %s2591_s7 = int_to_ptr.vmem [resolvable:$true] %s2590_s7 }
0x18d3   :  { %s3365_s30 = scalar_lea.vmem %s2591_s7, 32  ;;  %p3370_p8 = scmp.lt.s32.totalorder %s2591_s7, %s2591_s7 }
0x18d4   :  { %p3366_p7 = scmp.ne.s32.totalorder %s2591_s7, %s3365_s30  ;;  %p3371_p9 = scmp.lt.s32.totalorder %s3365_s30, %s3365_s30 }
0x18d6   :  { %p3372_p10 = por %p3371_p9, %p3370_p8 }
0x18d8   :  { %p3373_p11 = pnand %p3372_p10, %p3366_p7 }
0x18da   :  { %3376 = shalt.err (!%p3373_p11)
}
0x18db   :  { %2593 = dma.vmem_to_hbm [thread:$0]  %s2591_s7, 32, %s4072_s13, [#allocation15]   ;;  %v2652_v14 = vld [vmem:[#allocation11] ss:$0 sm:$0xff]  ;;  %vm2562_vm13 = vcmask 64512  }
0x18dc   :  { %s3433_s12 = smov [#allocation13]  }
0x18dd   :  { %s2570_s15 = sshll.u32 %s3433_s12, 4  ;;  %s2571_s15 = int_to_ptr.vmem [resolvable:$true] %s2570_s15 }
0x18de   :  { %s3385_s3 = scalar_lea.vmem %s2571_s15, 128  ;;  %p3390_p13 = scmp.lt.s32.totalorder %s2571_s15, %s2571_s15 }
0x18df   :  { %p3386_p12 = scmp.ne.s32.totalorder %s2571_s15, %s3385_s3  ;;  %p3391_p0 = scmp.lt.s32.totalorder %s3385_s3, %s3385_s3 }
0x18e1   :  { %p3392_p1 = por %p3391_p0, %p3390_p13 }
0x18e3   :  { %p3393_p2 = pnand %p3392_p1, %p3386_p12 }
0x1986   :  { %v2550_v9 = vpop.f32.mrf.mxu1 }
0x1987   :  { %v2551_v30 = vadd.f32 %v2652_v14, %v2550_v9 }
0x1988   :  { %v3058_v31 = vpop.f32.mrf.mxu1 }
0x1989   :  { %v2656_v32 = vmul.f32 -1.442695, %v2551_v30 }
0x198a   :  { %v2553_v34 = vpop.f32.mrf.mxu1 }
0x198b   :  { %3208 = vpow2.f32 %v2656_v32 }
0x198c   :  { %v3059_v37 = vpop.f32.mrf.mxu1 }
0x1998   :  { %v3209_v10 = vpop.eup %3208 }
0x1999   :  { %v2559_v8 = vadd.f32 1.0, %v3209_v10 }
0x199b   :  { %3210 = vrcp.f32 %v2559_v8 }
0x19a8   :  { %v3211_v33 = vpop.eup %3210 }
0x19a9   :  { %2563 = vst.msk [vmem:[#allocation13] sm:$0xff] %vm2562_vm13, %v3211_v33 }
0x19aa   :  { %3396 = shalt.err (!%p3393_p2)
}
0x19ab   :  { %2573 = dma.vmem_to_hbm [thread:$0]  %s2571_s15, 128, %s4070_s11, [#allocation4]  }
0x19ac   :  { %3413 = dma.done.wait [#allocation4], 128  }
0x19ad   :  { %3414 = vsyncadd [#allocation4], 4294967168 }
0x19ae   :  { %3415 = dma.done.wait [#allocation15], 64  }
0x19af   :  { %3416 = vsyncadd [#allocation15], 4294967232 }
0x19b0   :  { %2603 = vsyncpa [#allocation3], 1 }
0x19b1   :  { %2604 = vsyncpa [#allocation6], 1 }
0x19b2   :  { %2605 = vsyncpa [#allocation9], 1 }
0x19b3   :  { %2606 = vsyncpa [#allocation12], 1 }
0x19b4   :  { %2607 = vsyncpa [#allocation4], 1 }
0x19b5   :  { %2608 = vsyncpa [#allocation15], 1 }

</bundles_post_ra>
